<compile_context>
chip_gen: v5e
topology: v5e:2x2
jax: 0.10.0
libtpu: 0.0.40
codegen_flags: <defaults>
</compile_context>

<pallas_src>
import functools

import jax
import jax.numpy as jnp
from jax.experimental import pallas as pl
from jax.experimental.pallas import tpu as pltpu


def _lstm_fc_kernel(x_ref, wih_ref, whh_ref, b_ref, w1_ref, b1_ref, w2_ref, b2_ref,
                    out_ref, xw_sc, *, batch, hidden, seq_len):
    B, H, T = batch, hidden, seq_len

    # ---- Input projection for ALL timesteps in one matmul (bias added once). ----
    # x_ref: (T*B, I) time-major; xw_sc: (T*B, 4H).
    xw_sc[...] = (jnp.dot(x_ref[...], wih_ref[...], preferred_element_type=jnp.float32)
                  + b_ref[...])

    whh = whh_ref[...]  # (H, 4H), loaded once; only recurrent matmul stays in the loop.

    # ---- Recurrence: h/c live in vregs (loop carry), loop fully unrolled (static T). ----
    h = jnp.zeros((B, H), jnp.float32)
    c = jnp.zeros((B, H), jnp.float32)
    for t in range(T):                       # static unroll: T is small & known at trace time
        xw_t = xw_sc[t * B:(t + 1) * B, :]   # static, sublane-aligned slice -> (B, 4H)
        gates = xw_t + jnp.dot(h, whh, preferred_element_type=jnp.float32)
        # PyTorch gate order: input, forget, cell(g), output
        i_g = jax.nn.sigmoid(gates[:, 0 * H:1 * H])
        f_g = jax.nn.sigmoid(gates[:, 1 * H:2 * H])
        g_g = jnp.tanh(gates[:, 2 * H:3 * H])
        o_g = jax.nn.sigmoid(gates[:, 3 * H:4 * H])
        c = f_g * c + i_g * g_g
        h = o_g * jnp.tanh(c)

    # ---- FC head on last hidden state: fc1 -> ReLU -> fc2 (lane-dense padded widths). ----
    z1 = jnp.dot(h, w1_ref[...], preferred_element_type=jnp.float32) + b1_ref[...]
    z1 = jnp.maximum(z1, 0.0)
    z2 = jnp.dot(z1, w2_ref[...], preferred_element_type=jnp.float32) + b2_ref[...]
    out_ref[...] = z2.astype(out_ref.dtype)


def _round_up(v, m):
    return (v + m - 1) // m * m


@functools.partial(jax.jit, static_argnames=("hidden_size",))
def handwritten_rnn_forward(x, params, *, hidden_size):
    """x: (B, T, input_size) float32. params: dict of pre-transposed weights."""
    B, T, I = x.shape
    H = hidden_size
    FC1 = params["w1T"].shape[1]          # 200
    OUT = params["w2T"].shape[1]          # output_size

    B_pad = _round_up(max(B, 8), 8)       # fill sublanes
    FC1_pad = _round_up(FC1, 128)         # 200 -> 256
    OUT_pad = _round_up(OUT, 128)         # 10  -> 128 (lane-dense final store)

    # Zero-pad batch, go time-major, flatten: timestep t == contiguous rows [t*B_pad,(t+1)*B_pad).
    x_p = jnp.pad(x, ((0, B_pad - B), (0, 0), (0, 0)))
    x_tm = jnp.transpose(x_p, (1, 0, 2)).reshape(T * B_pad, I)

    wihT = params["wihT"]                                       # (I, 4H)
    whhT = params["whhT"]                                       # (H, 4H)
    b = (params["b_ih"] + params["b_hh"]).reshape(1, 4 * H)     # pre-summed LSTM biases

    # Zero-padded FC head (padding contributes exactly 0 to the real outputs).
    w1T = jnp.pad(params["w1T"], ((0, 0), (0, FC1_pad - FC1)))               # (H, 256)
    b1 = jnp.pad(params["b1"], (0, FC1_pad - FC1)).reshape(1, FC1_pad)       # (1, 256)
    w2T = jnp.pad(params["w2T"], ((0, FC1_pad - FC1), (0, OUT_pad - OUT)))   # (256, 128)
    b2 = jnp.pad(params["b2"], (0, OUT_pad - OUT)).reshape(1, OUT_pad)       # (1, 128)

    kernel = functools.partial(_lstm_fc_kernel, batch=B_pad, hidden=H, seq_len=T)
    full = lambda shape: pl.BlockSpec(shape, lambda: tuple(0 for _ in shape))

    out_pad = pl.pallas_call(
        kernel,
        out_shape=jax.ShapeDtypeStruct((B_pad, OUT_pad), jnp.float32),
        grid=(),
        in_specs=[
            full(x_tm.shape),
            full(wihT.shape),
            full(whhT.shape),
            full(b.shape),
            full(w1T.shape),
            full(b1.shape),
            full(w2T.shape),
            full(b2.shape),
        ],
        out_specs=full((B_pad, OUT_pad)),
        scratch_shapes=[
            pltpu.VMEM((T * B_pad, 4 * H), jnp.float32),   # precomputed x @ W_ih^T + b
        ],
    )(x_tm, wihT, whhT, b, w1T, b1, w2T, b2)

    return out_pad[:B, :OUT]


def init_params(key, input_size, hidden_size, output_size):
    """Deterministic init mimicking PyTorch's uniform(-1/sqrt(fan), 1/sqrt(fan)) shapes."""
    H = hidden_size
    ks = jax.random.split(key, 8)
    s = 1.0 / jnp.sqrt(H)
    u = lambda k, shape, scale: jax.random.uniform(k, shape, jnp.float32, -scale, scale)
    return {
        # LSTM weights (stored pre-transposed for the kernel)
        "wihT": u(ks[0], (input_size, 4 * H), s),
        "whhT": u(ks[1], (H, 4 * H), s),
        "b_ih": u(ks[2], (4 * H,), s),
        "b_hh": u(ks[3], (4 * H,), s),
        # fc1: Linear(H, 200)
        "w1T": u(ks[4], (H, 200), 1.0 / jnp.sqrt(H)),
        "b1": u(ks[5], (200,), 1.0 / jnp.sqrt(H)),
        # fc2: Linear(200, output_size)
        "w2T": u(ks[6], (200, output_size), 1.0 / jnp.sqrt(200.0)),
        "b2": u(ks[7], (output_size,), 1.0 / jnp.sqrt(200.0)),
    }


def reference_forward(x, params, hidden_size):
    """Pure-JAX reference replicating the PyTorch forward (sanity check)."""
    B, T, I = x.shape
    H = hidden_size
    b = (params["b_ih"] + params["b_hh"]).reshape(1, 4 * H)
    h = jnp.zeros((B, H), jnp.float32)
    c = jnp.zeros((B, H), jnp.float32)
    for t in range(T):
        gates = x[:, t, :] @ params["wihT"] + h @ params["whhT"] + b
        i_g = jax.nn.sigmoid(gates[:, 0 * H:1 * H])
        f_g = jax.nn.sigmoid(gates[:, 1 * H:2 * H])
        g_g = jnp.tanh(gates[:, 2 * H:3 * H])
        o_g = jax.nn.sigmoid(gates[:, 3 * H:4 * H])
        c = f_g * c + i_g * g_g
        h = o_g * jnp.tanh(c)
    z1 = jnp.maximum(h @ params["w1T"] + params["b1"], 0.0)
    return z1 @ params["w2T"] + params["b2"]


if __name__ == "__main__":
    # Small shapes consistent with the module: input_size=6 (module default),
    # hidden_size kept small (128, lane-aligned), fc1 width 200, output_size=10.
    B, T, I, H, OUT = 2, 8, 6, 128, 10

    key = jax.random.PRNGKey(0)
    k_x, k_p = jax.random.split(key)
    x = jax.random.normal(k_x, (B, T, I), jnp.float32)
    params = init_params(k_p, I, H, OUT)

    out = handwritten_rnn_forward(x, params, hidden_size=H)
    out = jax.block_until_ready(out)

    ref = reference_forward(x, params, H)
    assert out.shape == (B, OUT)
    assert jnp.allclose(out, ref, atol=1e-4, rtol=1e-4), "Pallas output mismatch vs reference"

    print("KERNEL_OK")
</pallas_src>

<mosaic_0001>
module attributes {stable_mosaic.version = 11 : i64} {
  func.func @_lstm_fc_kernel(%arg0: memref<64x6xf32, #tpu.memory_space<vmem>>, %arg1: memref<6x512xf32, #tpu.memory_space<vmem>>, %arg2: memref<128x512xf32, #tpu.memory_space<vmem>>, %arg3: memref<1x512xf32, #tpu.memory_space<vmem>>, %arg4: memref<128x256xf32, #tpu.memory_space<vmem>>, %arg5: memref<1x256xf32, #tpu.memory_space<vmem>>, %arg6: memref<256x128xf32, #tpu.memory_space<vmem>>, %arg7: memref<1x128xf32, #tpu.memory_space<vmem>>, %arg8: memref<8x128xf32, #tpu.memory_space<vmem>>, %arg9: memref<64x512xf32, #tpu.memory_space<vmem>>) attributes {dimension_semantics = [], scalar_prefetch = 0 : i64, scratch_operands = 1 : i64, tpu.core_type = #tpu.core_type<tc>} {
    %c0 = arith.constant 0 : index
    %c0_0 = arith.constant 0 : index
    %0 = vector.load %arg0[%c0, %c0_0] : memref<64x6xf32, #tpu.memory_space<vmem>>, vector<64x6xf32>
    %c0_1 = arith.constant 0 : index
    %c0_2 = arith.constant 0 : index
    %1 = vector.load %arg1[%c0_1, %c0_2] : memref<6x512xf32, #tpu.memory_space<vmem>>, vector<6x512xf32>
    %cst = arith.constant dense<0.000000e+00> : vector<64x512xf32>
    %2 = tpu.matmul %0, %1, %cst {dimension_numbers = #tpu.dot_dimension_numbers<[1], [0], [0], [1], [0, 0, 1, 1], [], []>} : vector<64x6xf32>, vector<6x512xf32>, vector<64x512xf32> -> vector<64x512xf32>
    %c0_3 = arith.constant 0 : index
    %c0_4 = arith.constant 0 : index
    %3 = vector.load %arg3[%c0_3, %c0_4] : memref<1x512xf32, #tpu.memory_space<vmem>>, vector<1x512xf32>
    %4 = vector.broadcast %3 : vector<1x512xf32> to vector<64x512xf32>
    %5 = arith.addf %2, %4 : vector<64x512xf32>
    %c0_5 = arith.constant 0 : index
    %c0_6 = arith.constant 0 : index
    %6 = vector.load %arg9[%c0_5, %c0_6] : memref<64x512xf32, #tpu.memory_space<vmem>>, vector<64x512xf32>
    tpu.vector_store %arg9[%c0_5, %c0_6], %5 {strides = array<i32>} : memref<64x512xf32, #tpu.memory_space<vmem>>, vector<64x512xf32>,
    %c0_7 = arith.constant 0 : index
    %c0_8 = arith.constant 0 : index
    %7 = vector.load %arg2[%c0_7, %c0_8] : memref<128x512xf32, #tpu.memory_space<vmem>>, vector<128x512xf32>
    %cst_9 = arith.constant 0.000000e+00 : f32
    %8 = vector.broadcast %cst_9 : f32 to vector<8x128xf32>
    %cst_10 = arith.constant 0.000000e+00 : f32
    %9 = vector.broadcast %cst_10 : f32 to vector<8x128xf32>
    %c0_11 = arith.constant 0 : index
    %c0_12 = arith.constant 0 : index
    %10 = vector.load %arg9[%c0_11, %c0_12] : memref<64x512xf32, #tpu.memory_space<vmem>>, vector<8x512xf32>
    %cst_13 = arith.constant dense<0.000000e+00> : vector<8x512xf32>
    %11 = tpu.matmul %8, %7, %cst_13 {dimension_numbers = #tpu.dot_dimension_numbers<[1], [0], [0], [1], [0, 0, 1, 1], [], []>} : vector<8x128xf32>, vector<128x512xf32>, vector<8x512xf32> -> vector<8x512xf32>
    %12 = arith.addf %10, %11 : vector<8x512xf32>
    %13 = vector.extract_strided_slice %12 {offsets = [0, 0], sizes = [8, 128], strides = [1, 1]} : vector<8x512xf32> to vector<8x128xf32>
    %14 = arith.negf %13 : vector<8x128xf32>
    %15 = math.exp %14 : vector<8x128xf32>
    %cst_14 = arith.constant 1.000000e+00 : f32
    %16 = vector.broadcast %cst_14 : f32 to vector<8x128xf32>
    %17 = arith.addf %16, %15 : vector<8x128xf32>
    %18 = arith.divf %16, %17 : vector<8x128xf32>
    %19 = vector.extract_strided_slice %12 {offsets = [0, 128], sizes = [8, 128], strides = [1, 1]} : vector<8x512xf32> to vector<8x128xf32>
    %20 = arith.negf %19 : vector<8x128xf32>
    %21 = math.exp %20 : vector<8x128xf32>
    %cst_15 = arith.constant 1.000000e+00 : f32
    %22 = vector.broadcast %cst_15 : f32 to vector<8x128xf32>
    %23 = arith.addf %22, %21 : vector<8x128xf32>
    %24 = arith.divf %22, %23 : vector<8x128xf32>
    %25 = vector.extract_strided_slice %12 {offsets = [0, 256], sizes = [8, 128], strides = [1, 1]} : vector<8x512xf32> to vector<8x128xf32>
    %26 = math.tanh %25 : vector<8x128xf32>
    %27 = vector.extract_strided_slice %12 {offsets = [0, 384], sizes = [8, 128], strides = [1, 1]} : vector<8x512xf32> to vector<8x128xf32>
    %28 = arith.negf %27 : vector<8x128xf32>
    %29 = math.exp %28 : vector<8x128xf32>
    %cst_16 = arith.constant 1.000000e+00 : f32
    %30 = vector.broadcast %cst_16 : f32 to vector<8x128xf32>
    %31 = arith.addf %30, %29 : vector<8x128xf32>
    %32 = arith.divf %30, %31 : vector<8x128xf32>
    %33 = arith.mulf %24, %9 : vector<8x128xf32>
    %34 = arith.mulf %18, %26 : vector<8x128xf32>
    %35 = arith.addf %33, %34 : vector<8x128xf32>
    %36 = math.tanh %35 : vector<8x128xf32>
    %37 = arith.mulf %32, %36 : vector<8x128xf32>
    %c8 = arith.constant 8 : index
    %c0_17 = arith.constant 0 : index
    %38 = vector.load %arg9[%c8, %c0_17] : memref<64x512xf32, #tpu.memory_space<vmem>>, vector<8x512xf32>
    %cst_18 = arith.constant dense<0.000000e+00> : vector<8x512xf32>
    %39 = tpu.matmul %37, %7, %cst_18 {dimension_numbers = #tpu.dot_dimension_numbers<[1], [0], [0], [1], [0, 0, 1, 1], [], []>} : vector<8x128xf32>, vector<128x512xf32>, vector<8x512xf32> -> vector<8x512xf32>
    %40 = arith.addf %38, %39 : vector<8x512xf32>
    %41 = vector.extract_strided_slice %40 {offsets = [0, 0], sizes = [8, 128], strides = [1, 1]} : vector<8x512xf32> to vector<8x128xf32>
    %42 = arith.negf %41 : vector<8x128xf32>
    %43 = math.exp %42 : vector<8x128xf32>
    %cst_19 = arith.constant 1.000000e+00 : f32
    %44 = vector.broadcast %cst_19 : f32 to vector<8x128xf32>
    %45 = arith.addf %44, %43 : vector<8x128xf32>
    %46 = arith.divf %44, %45 : vector<8x128xf32>
    %47 = vector.extract_strided_slice %40 {offsets = [0, 128], sizes = [8, 128], strides = [1, 1]} : vector<8x512xf32> to vector<8x128xf32>
    %48 = arith.negf %47 : vector<8x128xf32>
    %49 = math.exp %48 : vector<8x128xf32>
    %cst_20 = arith.constant 1.000000e+00 : f32
    %50 = vector.broadcast %cst_20 : f32 to vector<8x128xf32>
    %51 = arith.addf %50, %49 : vector<8x128xf32>
    %52 = arith.divf %50, %51 : vector<8x128xf32>
    %53 = vector.extract_strided_slice %40 {offsets = [0, 256], sizes = [8, 128], strides = [1, 1]} : vector<8x512xf32> to vector<8x128xf32>
    %54 = math.tanh %53 : vector<8x128xf32>
    %55 = vector.extract_strided_slice %40 {offsets = [0, 384], sizes = [8, 128], strides = [1, 1]} : vector<8x512xf32> to vector<8x128xf32>
    %56 = arith.negf %55 : vector<8x128xf32>
    %57 = math.exp %56 : vector<8x128xf32>
    %cst_21 = arith.constant 1.000000e+00 : f32
    %58 = vector.broadcast %cst_21 : f32 to vector<8x128xf32>
    %59 = arith.addf %58, %57 : vector<8x128xf32>
    %60 = arith.divf %58, %59 : vector<8x128xf32>
    %61 = arith.mulf %52, %35 : vector<8x128xf32>
    %62 = arith.mulf %46, %54 : vector<8x128xf32>
    %63 = arith.addf %61, %62 : vector<8x128xf32>
    %64 = math.tanh %63 : vector<8x128xf32>
    %65 = arith.mulf %60, %64 : vector<8x128xf32>
    %c16 = arith.constant 16 : index
    %c0_22 = arith.constant 0 : index
    %66 = vector.load %arg9[%c16, %c0_22] : memref<64x512xf32, #tpu.memory_space<vmem>>, vector<8x512xf32>
    %cst_23 = arith.constant dense<0.000000e+00> : vector<8x512xf32>
    %67 = tpu.matmul %65, %7, %cst_23 {dimension_numbers = #tpu.dot_dimension_numbers<[1], [0], [0], [1], [0, 0, 1, 1], [], []>} : vector<8x128xf32>, vector<128x512xf32>, vector<8x512xf32> -> vector<8x512xf32>
    %68 = arith.addf %66, %67 : vector<8x512xf32>
    %69 = vector.extract_strided_slice %68 {offsets = [0, 0], sizes = [8, 128], strides = [1, 1]} : vector<8x512xf32> to vector<8x128xf32>
    %70 = arith.negf %69 : vector<8x128xf32>
    %71 = math.exp %70 : vector<8x128xf32>
    %cst_24 = arith.constant 1.000000e+00 : f32
    %72 = vector.broadcast %cst_24 : f32 to vector<8x128xf32>
    %73 = arith.addf %72, %71 : vector<8x128xf32>
    %74 = arith.divf %72, %73 : vector<8x128xf32>
    %75 = vector.extract_strided_slice %68 {offsets = [0, 128], sizes = [8, 128], strides = [1, 1]} : vector<8x512xf32> to vector<8x128xf32>
    %76 = arith.negf %75 : vector<8x128xf32>
    %77 = math.exp %76 : vector<8x128xf32>
    %cst_25 = arith.constant 1.000000e+00 : f32
    %78 = vector.broadcast %cst_25 : f32 to vector<8x128xf32>
    %79 = arith.addf %78, %77 : vector<8x128xf32>
    %80 = arith.divf %78, %79 : vector<8x128xf32>
    %81 = vector.extract_strided_slice %68 {offsets = [0, 256], sizes = [8, 128], strides = [1, 1]} : vector<8x512xf32> to vector<8x128xf32>
    %82 = math.tanh %81 : vector<8x128xf32>
    %83 = vector.extract_strided_slice %68 {offsets = [0, 384], sizes = [8, 128], strides = [1, 1]} : vector<8x512xf32> to vector<8x128xf32>
    %84 = arith.negf %83 : vector<8x128xf32>
    %85 = math.exp %84 : vector<8x128xf32>
    %cst_26 = arith.constant 1.000000e+00 : f32
    %86 = vector.broadcast %cst_26 : f32 to vector<8x128xf32>
    %87 = arith.addf %86, %85 : vector<8x128xf32>
    %88 = arith.divf %86, %87 : vector<8x128xf32>
    %89 = arith.mulf %80, %63 : vector<8x128xf32>
    %90 = arith.mulf %74, %82 : vector<8x128xf32>
    %91 = arith.addf %89, %90 : vector<8x128xf32>
    %92 = math.tanh %91 : vector<8x128xf32>
    %93 = arith.mulf %88, %92 : vector<8x128xf32>
    %c24 = arith.constant 24 : index
    %c0_27 = arith.constant 0 : index
    %94 = vector.load %arg9[%c24, %c0_27] : memref<64x512xf32, #tpu.memory_space<vmem>>, vector<8x512xf32>
    %cst_28 = arith.constant dense<0.000000e+00> : vector<8x512xf32>
    %95 = tpu.matmul %93, %7, %cst_28 {dimension_numbers = #tpu.dot_dimension_numbers<[1], [0], [0], [1], [0, 0, 1, 1], [], []>} : vector<8x128xf32>, vector<128x512xf32>, vector<8x512xf32> -> vector<8x512xf32>
    %96 = arith.addf %94, %95 : vector<8x512xf32>
    %97 = vector.extract_strided_slice %96 {offsets = [0, 0], sizes = [8, 128], strides = [1, 1]} : vector<8x512xf32> to vector<8x128xf32>
    %98 = arith.negf %97 : vector<8x128xf32>
    %99 = math.exp %98 : vector<8x128xf32>
    %cst_29 = arith.constant 1.000000e+00 : f32
    %100 = vector.broadcast %cst_29 : f32 to vector<8x128xf32>
    %101 = arith.addf %100, %99 : vector<8x128xf32>
    %102 = arith.divf %100, %101 : vector<8x128xf32>
    %103 = vector.extract_strided_slice %96 {offsets = [0, 128], sizes = [8, 128], strides = [1, 1]} : vector<8x512xf32> to vector<8x128xf32>
    %104 = arith.negf %103 : vector<8x128xf32>
    %105 = math.exp %104 : vector<8x128xf32>
    %cst_30 = arith.constant 1.000000e+00 : f32
    %106 = vector.broadcast %cst_30 : f32 to vector<8x128xf32>
    %107 = arith.addf %106, %105 : vector<8x128xf32>
    %108 = arith.divf %106, %107 : vector<8x128xf32>
    %109 = vector.extract_strided_slice %96 {offsets = [0, 256], sizes = [8, 128], strides = [1, 1]} : vector<8x512xf32> to vector<8x128xf32>
    %110 = math.tanh %109 : vector<8x128xf32>
    %111 = vector.extract_strided_slice %96 {offsets = [0, 384], sizes = [8, 128], strides = [1, 1]} : vector<8x512xf32> to vector<8x128xf32>
    %112 = arith.negf %111 : vector<8x128xf32>
    %113 = math.exp %112 : vector<8x128xf32>
    %cst_31 = arith.constant 1.000000e+00 : f32
    %114 = vector.broadcast %cst_31 : f32 to vector<8x128xf32>
    %115 = arith.addf %114, %113 : vector<8x128xf32>
    %116 = arith.divf %114, %115 : vector<8x128xf32>
    %117 = arith.mulf %108, %91 : vector<8x128xf32>
    %118 = arith.mulf %102, %110 : vector<8x128xf32>
    %119 = arith.addf %117, %118 : vector<8x128xf32>
    %120 = math.tanh %119 : vector<8x128xf32>
    %121 = arith.mulf %116, %120 : vector<8x128xf32>
    %c32 = arith.constant 32 : index
    %c0_32 = arith.constant 0 : index
    %122 = vector.load %arg9[%c32, %c0_32] : memref<64x512xf32, #tpu.memory_space<vmem>>, vector<8x512xf32>
    %cst_33 = arith.constant dense<0.000000e+00> : vector<8x512xf32>
    %123 = tpu.matmul %121, %7, %cst_33 {dimension_numbers = #tpu.dot_dimension_numbers<[1], [0], [0], [1], [0, 0, 1, 1], [], []>} : vector<8x128xf32>, vector<128x512xf32>, vector<8x512xf32> -> vector<8x512xf32>
    %124 = arith.addf %122, %123 : vector<8x512xf32>
    %125 = vector.extract_strided_slice %124 {offsets = [0, 0], sizes = [8, 128], strides = [1, 1]} : vector<8x512xf32> to vector<8x128xf32>
    %126 = arith.negf %125 : vector<8x128xf32>
    %127 = math.exp %126 : vector<8x128xf32>
    %cst_34 = arith.constant 1.000000e+00 : f32
    %128 = vector.broadcast %cst_34 : f32 to vector<8x128xf32>
    %129 = arith.addf %128, %127 : vector<8x128xf32>
    %130 = arith.divf %128, %129 : vector<8x128xf32>
    %131 = vector.extract_strided_slice %124 {offsets = [0, 128], sizes = [8, 128], strides = [1, 1]} : vector<8x512xf32> to vector<8x128xf32>
    %132 = arith.negf %131 : vector<8x128xf32>
    %133 = math.exp %132 : vector<8x128xf32>
    %cst_35 = arith.constant 1.000000e+00 : f32
    %134 = vector.broadcast %cst_35 : f32 to vector<8x128xf32>
    %135 = arith.addf %134, %133 : vector<8x128xf32>
    %136 = arith.divf %134, %135 : vector<8x128xf32>
    %137 = vector.extract_strided_slice %124 {offsets = [0, 256], sizes = [8, 128], strides = [1, 1]} : vector<8x512xf32> to vector<8x128xf32>
    %138 = math.tanh %137 : vector<8x128xf32>
    %139 = vector.extract_strided_slice %124 {offsets = [0, 384], sizes = [8, 128], strides = [1, 1]} : vector<8x512xf32> to vector<8x128xf32>
    %140 = arith.negf %139 : vector<8x128xf32>
    %141 = math.exp %140 : vector<8x128xf32>
    %cst_36 = arith.constant 1.000000e+00 : f32
    %142 = vector.broadcast %cst_36 : f32 to vector<8x128xf32>
    %143 = arith.addf %142, %141 : vector<8x128xf32>
    %144 = arith.divf %142, %143 : vector<8x128xf32>
    %145 = arith.mulf %136, %119 : vector<8x128xf32>
    %146 = arith.mulf %130, %138 : vector<8x128xf32>
    %147 = arith.addf %145, %146 : vector<8x128xf32>
    %148 = math.tanh %147 : vector<8x128xf32>
    %149 = arith.mulf %144, %148 : vector<8x128xf32>
    %c40 = arith.constant 40 : index
    %c0_37 = arith.constant 0 : index
    %150 = vector.load %arg9[%c40, %c0_37] : memref<64x512xf32, #tpu.memory_space<vmem>>, vector<8x512xf32>
    %cst_38 = arith.constant dense<0.000000e+00> : vector<8x512xf32>
    %151 = tpu.matmul %149, %7, %cst_38 {dimension_numbers = #tpu.dot_dimension_numbers<[1], [0], [0], [1], [0, 0, 1, 1], [], []>} : vector<8x128xf32>, vector<128x512xf32>, vector<8x512xf32> -> vector<8x512xf32>
    %152 = arith.addf %150, %151 : vector<8x512xf32>
    %153 = vector.extract_strided_slice %152 {offsets = [0, 0], sizes = [8, 128], strides = [1, 1]} : vector<8x512xf32> to vector<8x128xf32>
    %154 = arith.negf %153 : vector<8x128xf32>
    %155 = math.exp %154 : vector<8x128xf32>
    %cst_39 = arith.constant 1.000000e+00 : f32
    %156 = vector.broadcast %cst_39 : f32 to vector<8x128xf32>
    %157 = arith.addf %156, %155 : vector<8x128xf32>
    %158 = arith.divf %156, %157 : vector<8x128xf32>
    %159 = vector.extract_strided_slice %152 {offsets = [0, 128], sizes = [8, 128], strides = [1, 1]} : vector<8x512xf32> to vector<8x128xf32>
    %160 = arith.negf %159 : vector<8x128xf32>
    %161 = math.exp %160 : vector<8x128xf32>
    %cst_40 = arith.constant 1.000000e+00 : f32
    %162 = vector.broadcast %cst_40 : f32 to vector<8x128xf32>
    %163 = arith.addf %162, %161 : vector<8x128xf32>
    %164 = arith.divf %162, %163 : vector<8x128xf32>
    %165 = vector.extract_strided_slice %152 {offsets = [0, 256], sizes = [8, 128], strides = [1, 1]} : vector<8x512xf32> to vector<8x128xf32>
    %166 = math.tanh %165 : vector<8x128xf32>
    %167 = vector.extract_strided_slice %152 {offsets = [0, 384], sizes = [8, 128], strides = [1, 1]} : vector<8x512xf32> to vector<8x128xf32>
    %168 = arith.negf %167 : vector<8x128xf32>
    %169 = math.exp %168 : vector<8x128xf32>
    %cst_41 = arith.constant 1.000000e+00 : f32
    %170 = vector.broadcast %cst_41 : f32 to vector<8x128xf32>
    %171 = arith.addf %170, %169 : vector<8x128xf32>
    %172 = arith.divf %170, %171 : vector<8x128xf32>
    %173 = arith.mulf %164, %147 : vector<8x128xf32>
    %174 = arith.mulf %158, %166 : vector<8x128xf32>
    %175 = arith.addf %173, %174 : vector<8x128xf32>
    %176 = math.tanh %175 : vector<8x128xf32>
    %177 = arith.mulf %172, %176 : vector<8x128xf32>
    %c48 = arith.constant 48 : index
    %c0_42 = arith.constant 0 : index
    %178 = vector.load %arg9[%c48, %c0_42] : memref<64x512xf32, #tpu.memory_space<vmem>>, vector<8x512xf32>
    %cst_43 = arith.constant dense<0.000000e+00> : vector<8x512xf32>
    %179 = tpu.matmul %177, %7, %cst_43 {dimension_numbers = #tpu.dot_dimension_numbers<[1], [0], [0], [1], [0, 0, 1, 1], [], []>} : vector<8x128xf32>, vector<128x512xf32>, vector<8x512xf32> -> vector<8x512xf32>
    %180 = arith.addf %178, %179 : vector<8x512xf32>
    %181 = vector.extract_strided_slice %180 {offsets = [0, 0], sizes = [8, 128], strides = [1, 1]} : vector<8x512xf32> to vector<8x128xf32>
    %182 = arith.negf %181 : vector<8x128xf32>
    %183 = math.exp %182 : vector<8x128xf32>
    %cst_44 = arith.constant 1.000000e+00 : f32
    %184 = vector.broadcast %cst_44 : f32 to vector<8x128xf32>
    %185 = arith.addf %184, %183 : vector<8x128xf32>
    %186 = arith.divf %184, %185 : vector<8x128xf32>
    %187 = vector.extract_strided_slice %180 {offsets = [0, 128], sizes = [8, 128], strides = [1, 1]} : vector<8x512xf32> to vector<8x128xf32>
    %188 = arith.negf %187 : vector<8x128xf32>
    %189 = math.exp %188 : vector<8x128xf32>
    %cst_45 = arith.constant 1.000000e+00 : f32
    %190 = vector.broadcast %cst_45 : f32 to vector<8x128xf32>
    %191 = arith.addf %190, %189 : vector<8x128xf32>
    %192 = arith.divf %190, %191 : vector<8x128xf32>
    %193 = vector.extract_strided_slice %180 {offsets = [0, 256], sizes = [8, 128], strides = [1, 1]} : vector<8x512xf32> to vector<8x128xf32>
    %194 = math.tanh %193 : vector<8x128xf32>
    %195 = vector.extract_strided_slice %180 {offsets = [0, 384], sizes = [8, 128], strides = [1, 1]} : vector<8x512xf32> to vector<8x128xf32>
    %196 = arith.negf %195 : vector<8x128xf32>
    %197 = math.exp %196 : vector<8x128xf32>
    %cst_46 = arith.constant 1.000000e+00 : f32
    %198 = vector.broadcast %cst_46 : f32 to vector<8x128xf32>
    %199 = arith.addf %198, %197 : vector<8x128xf32>
    %200 = arith.divf %198, %199 : vector<8x128xf32>
    %201 = arith.mulf %192, %175 : vector<8x128xf32>
    %202 = arith.mulf %186, %194 : vector<8x128xf32>
    %203 = arith.addf %201, %202 : vector<8x128xf32>
    %204 = math.tanh %203 : vector<8x128xf32>
    %205 = arith.mulf %200, %204 : vector<8x128xf32>
    %c56 = arith.constant 56 : index
    %c0_47 = arith.constant 0 : index
    %206 = vector.load %arg9[%c56, %c0_47] : memref<64x512xf32, #tpu.memory_space<vmem>>, vector<8x512xf32>
    %cst_48 = arith.constant dense<0.000000e+00> : vector<8x512xf32>
    %207 = tpu.matmul %205, %7, %cst_48 {dimension_numbers = #tpu.dot_dimension_numbers<[1], [0], [0], [1], [0, 0, 1, 1], [], []>} : vector<8x128xf32>, vector<128x512xf32>, vector<8x512xf32> -> vector<8x512xf32>
    %208 = arith.addf %206, %207 : vector<8x512xf32>
    %209 = vector.extract_strided_slice %208 {offsets = [0, 0], sizes = [8, 128], strides = [1, 1]} : vector<8x512xf32> to vector<8x128xf32>
    %210 = arith.negf %209 : vector<8x128xf32>
    %211 = math.exp %210 : vector<8x128xf32>
    %cst_49 = arith.constant 1.000000e+00 : f32
    %212 = vector.broadcast %cst_49 : f32 to vector<8x128xf32>
    %213 = arith.addf %212, %211 : vector<8x128xf32>
    %214 = arith.divf %212, %213 : vector<8x128xf32>
    %215 = vector.extract_strided_slice %208 {offsets = [0, 128], sizes = [8, 128], strides = [1, 1]} : vector<8x512xf32> to vector<8x128xf32>
    %216 = arith.negf %215 : vector<8x128xf32>
    %217 = math.exp %216 : vector<8x128xf32>
    %cst_50 = arith.constant 1.000000e+00 : f32
    %218 = vector.broadcast %cst_50 : f32 to vector<8x128xf32>
    %219 = arith.addf %218, %217 : vector<8x128xf32>
    %220 = arith.divf %218, %219 : vector<8x128xf32>
    %221 = vector.extract_strided_slice %208 {offsets = [0, 256], sizes = [8, 128], strides = [1, 1]} : vector<8x512xf32> to vector<8x128xf32>
    %222 = math.tanh %221 : vector<8x128xf32>
    %223 = vector.extract_strided_slice %208 {offsets = [0, 384], sizes = [8, 128], strides = [1, 1]} : vector<8x512xf32> to vector<8x128xf32>
    %224 = arith.negf %223 : vector<8x128xf32>
    %225 = math.exp %224 : vector<8x128xf32>
    %cst_51 = arith.constant 1.000000e+00 : f32
    %226 = vector.broadcast %cst_51 : f32 to vector<8x128xf32>
    %227 = arith.addf %226, %225 : vector<8x128xf32>
    %228 = arith.divf %226, %227 : vector<8x128xf32>
    %229 = arith.mulf %220, %203 : vector<8x128xf32>
    %230 = arith.mulf %214, %222 : vector<8x128xf32>
    %231 = arith.addf %229, %230 : vector<8x128xf32>
    %232 = math.tanh %231 : vector<8x128xf32>
    %233 = arith.mulf %228, %232 : vector<8x128xf32>
    %c0_52 = arith.constant 0 : index
    %c0_53 = arith.constant 0 : index
    %234 = vector.load %arg4[%c0_52, %c0_53] : memref<128x256xf32, #tpu.memory_space<vmem>>, vector<128x256xf32>
    %cst_54 = arith.constant dense<0.000000e+00> : vector<8x256xf32>
    %235 = tpu.matmul %233, %234, %cst_54 {dimension_numbers = #tpu.dot_dimension_numbers<[1], [0], [0], [1], [0, 0, 1, 1], [], []>} : vector<8x128xf32>, vector<128x256xf32>, vector<8x256xf32> -> vector<8x256xf32>
    %c0_55 = arith.constant 0 : index
    %c0_56 = arith.constant 0 : index
    %236 = vector.load %arg5[%c0_55, %c0_56] : memref<1x256xf32, #tpu.memory_space<vmem>>, vector<1x256xf32>
    %237 = vector.broadcast %236 : vector<1x256xf32> to vector<8x256xf32>
    %238 = arith.addf %235, %237 : vector<8x256xf32>
    %cst_57 = arith.constant 0.000000e+00 : f32
    %239 = vector.broadcast %cst_57 : f32 to vector<8x256xf32>
    %240 = arith.maximumf %238, %239 : vector<8x256xf32>
    %c0_58 = arith.constant 0 : index
    %c0_59 = arith.constant 0 : index
    %241 = vector.load %arg6[%c0_58, %c0_59] : memref<256x128xf32, #tpu.memory_space<vmem>>, vector<256x128xf32>
    %cst_60 = arith.constant dense<0.000000e+00> : vector<8x128xf32>
    %242 = tpu.matmul %240, %241, %cst_60 {dimension_numbers = #tpu.dot_dimension_numbers<[1], [0], [0], [1], [0, 0, 1, 1], [], []>} : vector<8x256xf32>, vector<256x128xf32>, vector<8x128xf32> -> vector<8x128xf32>
    %c0_61 = arith.constant 0 : index
    %c0_62 = arith.constant 0 : index
    %243 = vector.load %arg7[%c0_61, %c0_62] : memref<1x128xf32, #tpu.memory_space<vmem>>, vector<1x128xf32>
    %244 = vector.broadcast %243 : vector<1x128xf32> to vector<8x128xf32>
    %245 = arith.addf %242, %244 : vector<8x128xf32>
    %c0_63 = arith.constant 0 : index
    %c0_64 = arith.constant 0 : index
    %246 = vector.load %arg8[%c0_63, %c0_64] : memref<8x128xf32, #tpu.memory_space<vmem>>, vector<8x128xf32>
    tpu.vector_store %arg8[%c0_63, %c0_64], %245 {strides = array<i32>} : memref<8x128xf32, #tpu.memory_space<vmem>>, vector<8x128xf32>,
    return
  }
}

</mosaic_0001>

<bundles_post_ra>
// kernel: handwritten_rnn_forward.1
= control target key start
LH: loop header
LB: loop body
LE: loop exit
PB: predicated region body
PF: predicated region fallthrough
CT: control target
= control target key end

     0   :  { %vm76_vm0 = vcmask 1045504   ;;  %vm51_vm1 = vcmask 48128   ;;  %s3593_s1 = inlined_call_operand.vmem [shape: f32[6,512], index: 1, kind: input, shape index: {}]   ;;  %s3594_s0 = inlined_call_operand.vmem [shape: f32[64,6], index: 0, kind: input, shape index: {}]   ;;  %s3595_s2 = inlined_call_operand.vmem [shape: f32[128,512], index: 2, kind: input, shape index: {}]   ;;  %s3596_s3 = inlined_call_operand.vmem [shape: f32[1,512], index: 3, kind: input, shape index: {}]   ;;  %s3597_s4 = inlined_call_operand.vmem [shape: f32[128,256], index: 4, kind: input, shape index: {}]   ;;  %s3598_s6 = inlined_call_operand.vmem [shape: f32[256,128], index: 6, kind: input, shape index: {}]   ;;  %s3599_s7 = inlined_call_operand.vmem [shape: f32[1,128], index: 7, kind: input, shape index: {}]   ;;  %s3600_s5 = inlined_call_operand.vmem [shape: f32[1,256], index: 5, kind: input, shape index: {}]   ;;  %s3601_s8 = inlined_call_operand.vmem [shape: f32[8,128], index: 8, kind: output, shape index: {}]  }
   0x1   :  { %v37_v0 = vld [vmem:[%s3593_s1] sm:$0x3f]  ;;  %v38_v1 = vld [vmem:[%s3593_s1 + $0x8] sm:$0x3f]  ;;  %v39_v2 = vld [vmem:[%s3593_s1 + $0x10] sm:$0x3f] }
   0x2   :  { %1718 = vmatpush.msk.msra.mxu0 %vm76_vm0, %v37_v0  ;;  %1727 = vmatpush.msk.msra.mxu1 %vm76_vm0, %v38_v1  ;;  %v40_v3 = vld [vmem:[%s3593_s1 + $0x18] sm:$0x3f]  ;;  %v29_v4 = vld [vmem:[%s3594_s0] sm:$0xff]  ;;  %v2041_v6 = vld [vmem:[%s3595_s2 + $0x1e8] sm:$0xff] }
   0x3   :  { %1736 = vmatpush.msk.msra.mxu2 %vm76_vm0, %v39_v2  ;;  %1745 = vmatpush.msk.msra.mxu3 %vm76_vm0, %v40_v3  ;;  %v2036_v5 = vld [vmem:[%s3595_s2 + $0x1e0] sm:$0xff]  ;;  %v2048_v7 = vld [vmem:[%s3595_s2 + $0x1f8] sm:$0xff]  ;;  %v2060_v9 = vld [vmem:[%s3595_s2 + $0x1c8] sm:$0xff] }
   0x4   :  { %1719 = vmatmul.msk.f32.vlgmr.msra.gmra.mxu0 %vm51_vm1, %v29_v4  ;;  %1728 = vmatmul.msk.f32.vlgmr.msra.gmra.mxu1 %vm51_vm1, %v29_v4  ;;  %v2055_v8 = vld [vmem:[%s3595_s2 + $0x1c0] sm:$0xff]  ;;  %v2067_v10 = vld [vmem:[%s3595_s2 + $0x1d8] sm:$0xff]  ;;  %v2072_v11 = vld [vmem:[%s3595_s2 + $0x1f0] sm:$0xff] }
   0x5   :  { %1737 = vmatmul.msk.f32.vlgmr.msra.gmra.mxu2 %vm51_vm1, %v29_v4  ;;  %1746 = vmatmul.msk.f32.vlgmr.msra.gmra.mxu3 %vm51_vm1, %v29_v4  ;;  %v2078_v12 = vld [vmem:[%s3595_s2 + $0x1a0] sm:$0xff]  ;;  %v2083_v13 = vld [vmem:[%s3595_s2 + $0x1a8] sm:$0xff]  ;;  %v2091_v14 = vld [vmem:[%s3595_s2 + $0x1b8] sm:$0xff] }
   0x6   :  { %353 = vmatpush.msrb.mxu0 %v2036_v5  ;;  %373 = vmatpush.msrb.mxu1 %v2041_v6  ;;  %v2096_v15 = vld [vmem:[%s3595_s2 + $0x1d0] sm:$0xff]  ;;  %v30_v16 = vld [vmem:[%s3594_s0 + $0x8] sm:$0xff]  ;;  %v2113_v18 = vld [vmem:[%s3595_s2 + $0x180] sm:$0xff] }
   0x7   :  { %413 = vmatpush.msrb.mxu3 %v2048_v7  ;;  %393 = vmatpush.msrb.mxu2 %v2072_v11  ;;  %v2106_v17 = vld [vmem:[%s3595_s2 + $0x1b0] sm:$0xff]  ;;  %v2118_v19 = vld [vmem:[%s3595_s2 + $0x188] sm:$0xff]  ;;  %v2127_v20 = vld [vmem:[%s3595_s2 + $0x198] sm:$0xff] }
   0x8   :  { %354 = vmatpush.msrb.mxu0 %v2055_v8  ;;  %374 = vmatpush.msrb.mxu1 %v2060_v9  ;;  %v2132_v21 = vld [vmem:[%s3595_s2 + $0x190] sm:$0xff]  ;;  %v2139_v22 = vld [vmem:[%s3595_s2 + $0x160] sm:$0xff]  ;;  %v2144_v23 = vld [vmem:[%s3595_s2 + $0x168] sm:$0xff] }
   0x9   :  { %414 = vmatpush.msrb.mxu3 %v2067_v10  ;;  %394 = vmatpush.msrb.mxu2 %v2096_v15  ;;  %v2151_v24 = vld [vmem:[%s3595_s2 + $0x178] sm:$0xff]  ;;  %v2156_v25 = vld [vmem:[%s3595_s2 + $0x170] sm:$0xff]  ;;  %v2162_v26 = vld [vmem:[%s3595_s2 + $0x140] sm:$0xff] }
   0xa   :  { %355 = vmatpush.msrb.mxu0 %v2078_v12  ;;  %375 = vmatpush.msrb.mxu1 %v2083_v13  ;;  %v2167_v27 = vld [vmem:[%s3595_s2 + $0x148] sm:$0xff]  ;;  %v2175_v28 = vld [vmem:[%s3595_s2 + $0x158] sm:$0xff]  ;;  %v2180_v29 = vld [vmem:[%s3595_s2 + $0x150] sm:$0xff] }
   0xb   :  { %415 = vmatpush.msrb.mxu3 %v2091_v14  ;;  %395 = vmatpush.msrb.mxu2 %v2106_v17  ;;  %v31_v30 = vld [vmem:[%s3594_s0 + $0x10] sm:$0xff]  ;;  %v2192_v31 = vld [vmem:[%s3595_s2 + $0x120] sm:$0xff]  ;;  %v2197_v32 = vld [vmem:[%s3595_s2 + $0x128] sm:$0xff] }
   0xc   :  { %1720 = vmatmul.msk.f32.gmra.mxu0 %vm51_vm1, %v30_v16  ;;  %1729 = vmatmul.msk.f32.gmra.mxu1 %vm51_vm1, %v30_v16  ;;  %v2206_v33 = vld [vmem:[%s3595_s2 + $0x138] sm:$0xff]  ;;  %v2211_v34 = vld [vmem:[%s3595_s2 + $0x130] sm:$0xff]  ;;  %v2218_v35 = vld [vmem:[%s3595_s2 + $0x100] sm:$0xff] }
   0xd   :  { %1738 = vmatmul.msk.f32.gmra.mxu2 %vm51_vm1, %v30_v16  ;;  %1747 = vmatmul.msk.f32.gmra.mxu3 %vm51_vm1, %v30_v16  ;;  %v2223_v36 = vld [vmem:[%s3595_s2 + $0x108] sm:$0xff]  ;;  %v2230_v37 = vld [vmem:[%s3595_s2 + $0x118] sm:$0xff]  ;;  %v2235_v38 = vld [vmem:[%s3595_s2 + $0x110] sm:$0xff] }
   0xe   :  { %356 = vmatpush.msrb.mxu0 %v2113_v18  ;;  %376 = vmatpush.msrb.mxu1 %v2118_v19  ;;  %v2241_v39 = vld [vmem:[%s3595_s2 + $0xe0] sm:$0xff]  ;;  %v2246_v40 = vld [vmem:[%s3595_s2 + $0xe8] sm:$0xff]  ;;  %v2254_v41 = vld [vmem:[%s3595_s2 + $0xf8] sm:$0xff] }
   0xf   :  { %416 = vmatpush.msrb.mxu3 %v2127_v20  ;;  %396 = vmatpush.msrb.mxu2 %v2132_v21  ;;  %v2259_v42 = vld [vmem:[%s3595_s2 + $0xf0] sm:$0xff]  ;;  %v32_v43 = vld [vmem:[%s3594_s0 + $0x18] sm:$0xff]  ;;  %v2271_v44 = vld [vmem:[%s3595_s2 + $0xc0] sm:$0xff] }
  0x10   :  { %357 = vmatpush.msrb.mxu0 %v2139_v22  ;;  %377 = vmatpush.msrb.mxu1 %v2144_v23  ;;  %v2276_v45 = vld [vmem:[%s3595_s2 + $0xc8] sm:$0xff]  ;;  %v2285_v46 = vld [vmem:[%s3595_s2 + $0xd8] sm:$0xff]  ;;  %v2290_v47 = vld [vmem:[%s3595_s2 + $0xd0] sm:$0xff] }
  0x11   :  { %417 = vmatpush.msrb.mxu3 %v2151_v24  ;;  %397 = vmatpush.msrb.mxu2 %v2156_v25  ;;  %3689 = vst [vmem:[#allocation3_spill] sm:$0xff] %v2285_v46  ;;  %v2297_v48 = vld [vmem:[%s3595_s2 + $0xa0] sm:$0xff]  ;;  %v2302_v49 = vld [vmem:[%s3595_s2 + $0xa8] sm:$0xff]  ;;  %v2309_v50 = vld [vmem:[%s3595_s2 + $0xb8] sm:$0xff] }
  0x12   :  { %358 = vmatpush.msrb.mxu0 %v2162_v26  ;;  %378 = vmatpush.msrb.mxu1 %v2167_v27  ;;  %3690 = vst [vmem:[#allocation4_spill] sm:$0xff] %v2290_v47  ;;  %v2314_v51 = vld [vmem:[%s3595_s2 + $0xb0] sm:$0xff]  ;;  %v2320_v52 = vld [vmem:[%s3595_s2 + $0x80] sm:$0xff]  ;;  %v2325_v53 = vld [vmem:[%s3595_s2 + $0x88] sm:$0xff] }
  0x13   :  { %418 = vmatpush.msrb.mxu3 %v2175_v28  ;;  %398 = vmatpush.msrb.mxu2 %v2180_v29  ;;  %3691 = vst [vmem:[#allocation5_spill] sm:$0xff] %v2297_v48  ;;  %v2333_v54 = vld [vmem:[%s3595_s2 + $0x98] sm:$0xff]  ;;  %v2338_v55 = vld [vmem:[%s3595_s2 + $0x90] sm:$0xff]  ;;  %v33_v56 = vld [vmem:[%s3594_s0 + $0x20] sm:$0xff] }
  0x14   :  { %1721 = vmatmul.msk.f32.gmra.mxu0 %vm51_vm1, %v31_v30  ;;  %1730 = vmatmul.msk.f32.gmra.mxu1 %vm51_vm1, %v31_v30  ;;  %3692 = vst [vmem:[#allocation6_spill] sm:$0xff] %v2302_v49  ;;  %v2350_v57 = vld [vmem:[%s3595_s2 + $0x60] sm:$0xff]  ;;  %v2355_v58 = vld [vmem:[%s3595_s2 + $0x68] sm:$0xff]  ;;  %v2364_v59 = vld [vmem:[%s3595_s2 + $0x78] sm:$0xff] }
  0x15   :  { %1739 = vmatmul.msk.f32.gmra.mxu2 %vm51_vm1, %v31_v30  ;;  %1748 = vmatmul.msk.f32.gmra.mxu3 %vm51_vm1, %v31_v30  ;;  %3693 = vst [vmem:[#allocation7_spill] sm:$0xff] %v2309_v50  ;;  %v2369_v60 = vld [vmem:[%s3595_s2 + $0x70] sm:$0xff]  ;;  %v2376_v61 = vld [vmem:[%s3595_s2 + $0x40] sm:$0xff]  ;;  %v2381_v62 = vld [vmem:[%s3595_s2 + $0x48] sm:$0xff] }
  0x16   :  { %359 = vmatpush.msrb.mxu0 %v2192_v31  ;;  %379 = vmatpush.msrb.mxu1 %v2197_v32  ;;  %3694 = vst [vmem:[#allocation8_spill] sm:$0xff] %v2314_v51  ;;  %v2388_v63 = vld [vmem:[%s3595_s2 + $0x58] sm:$0xff]  ;;  %v2393_v0 = vld [vmem:[%s3595_s2 + $0x50] sm:$0xff]  ;;  %v2399_v1 = vld [vmem:[%s3595_s2 + $0x20] sm:$0xff] }
  0x17   :  { %419 = vmatpush.msrb.mxu3 %v2206_v33  ;;  %399 = vmatpush.msrb.mxu2 %v2211_v34  ;;  %3695 = vst [vmem:[#allocation9_spill] sm:$0xff] %v2320_v52  ;;  %v2404_v2 = vld [vmem:[%s3595_s2 + $0x28] sm:$0xff]  ;;  %v2412_v3 = vld [vmem:[%s3595_s2 + $0x30] sm:$0xff]  ;;  %v2417_v4 = vld [vmem:[%s3595_s2 + $0x38] sm:$0xff] }
  0x18   :  { %360 = vmatpush.msrb.mxu0 %v2218_v35  ;;  %380 = vmatpush.msrb.mxu1 %v2223_v36  ;;  %3696 = vst [vmem:[#allocation10_spill] sm:$0xff] %v2325_v53  ;;  %v34_v16 = vld [vmem:[%s3594_s0 + $0x28] sm:$0xff]  ;;  %v2429_v30 = vld [vmem:[%s3595_s2] sm:$0xff] }
  0x19   :  { %420 = vmatpush.msrb.mxu3 %v2230_v37  ;;  %400 = vmatpush.msrb.mxu2 %v2235_v38  ;;  %3697 = vst [vmem:[#allocation11_spill] sm:$0xff] %v2333_v54 }
  0x1a   :  { %361 = vmatpush.msrb.mxu0 %v2241_v39  ;;  %381 = vmatpush.msrb.mxu1 %v2246_v40  ;;  %3698 = vst [vmem:[#allocation12_spill] sm:$0xff] %v2338_v55 }
  0x1b   :  { %421 = vmatpush.msrb.mxu3 %v2254_v41  ;;  %401 = vmatpush.msrb.mxu2 %v2259_v42  ;;  %3699 = vst [vmem:[#allocation13_spill] sm:$0xff] %v2350_v57 }
  0x1c   :  { %1722 = vmatmul.msk.f32.gmra.mxu0 %vm51_vm1, %v32_v43  ;;  %1731 = vmatmul.msk.f32.gmra.mxu1 %vm51_vm1, %v32_v43  ;;  %3700 = vst [vmem:[#allocation14_spill] sm:$0xff] %v2355_v58 }
  0x1d   :  { %1740 = vmatmul.msk.f32.gmra.mxu2 %vm51_vm1, %v32_v43  ;;  %1749 = vmatmul.msk.f32.gmra.mxu3 %vm51_vm1, %v32_v43  ;;  %3701 = vst [vmem:[#allocation15_spill] sm:$0xff] %v2364_v59  ;;  %v2434_v43 = vld [vmem:[%s3595_s2 + $0x8] sm:$0xff] }
  0x1e   :  { %362 = vmatpush.msrb.mxu0 %v2271_v44  ;;  %382 = vmatpush.msrb.mxu1 %v2276_v45  ;;  %3702 = vst [vmem:[#allocation16_spill] sm:$0xff] %v2369_v60 }
  0x1f   :  { %422 = vmatpush.msrb.mxu3 %v2285_v46  ;;  %402 = vmatpush.msrb.mxu2 %v2290_v47  ;;  %3703 = vst [vmem:[#allocation17_spill] sm:$0xff] %v2376_v61 }
  0x20   :  { %363 = vmatpush.msrb.mxu0 %v2297_v48  ;;  %383 = vmatpush.msrb.mxu1 %v2302_v49  ;;  %3704 = vst [vmem:[#allocation18_spill] sm:$0xff] %v2381_v62 }
  0x21   :  { %423 = vmatpush.msrb.mxu3 %v2309_v50  ;;  %403 = vmatpush.msrb.mxu2 %v2314_v51  ;;  %3705 = vst [vmem:[#allocation19_spill] sm:$0xff] %v2388_v63 }
  0x22   :  { %364 = vmatpush.msrb.mxu0 %v2320_v52  ;;  %384 = vmatpush.msrb.mxu1 %v2325_v53  ;;  %3706 = vst [vmem:[#allocation20_spill] sm:$0xff] %v2393_v0 }
  0x23   :  { %424 = vmatpush.msrb.mxu3 %v2333_v54  ;;  %404 = vmatpush.msrb.mxu2 %v2338_v55  ;;  %3707 = vst [vmem:[#allocation21_spill] sm:$0xff] %v2399_v1 }
  0x24   :  { %1723 = vmatmul.msk.f32.gmra.mxu0 %vm51_vm1, %v33_v56  ;;  %1732 = vmatmul.msk.f32.gmra.mxu1 %vm51_vm1, %v33_v56  ;;  %3708 = vst [vmem:[#allocation22_spill] sm:$0xff] %v2404_v2 }
  0x25   :  { %1741 = vmatmul.msk.f32.gmra.mxu2 %vm51_vm1, %v33_v56  ;;  %1750 = vmatmul.msk.f32.gmra.mxu3 %vm51_vm1, %v33_v56  ;;  %3709 = vst [vmem:[#allocation23_spill] sm:$0xff] %v2412_v3  ;;  %v2443_v56 = vld [vmem:[%s3595_s2 + $0x10] sm:$0xff] }
  0x26   :  { %365 = vmatpush.msrb.mxu0 %v2350_v57  ;;  %385 = vmatpush.msrb.mxu1 %v2355_v58  ;;  %3710 = vst [vmem:[#allocation24_spill] sm:$0xff] %v2417_v4 }
  0x27   :  { %425 = vmatpush.msrb.mxu3 %v2364_v59  ;;  %405 = vmatpush.msrb.mxu2 %v2369_v60  ;;  %3711 = vst [vmem:[#allocation25_spill] sm:$0xff] %v2429_v30 }
  0x28   :  { %366 = vmatpush.msrb.mxu0 %v2376_v61  ;;  %386 = vmatpush.msrb.mxu1 %v2381_v62  ;;  %3712 = vst [vmem:[#allocation26_spill] sm:$0xff] %v2434_v43 }
  0x29   :  { %426 = vmatpush.msrb.mxu3 %v2388_v63  ;;  %406 = vmatpush.msrb.mxu2 %v2393_v0  ;;  %3713 = vst [vmem:[#allocation27_spill] sm:$0xff] %v2443_v56 }
  0x2a   :  { %367 = vmatpush.msrb.mxu0 %v2399_v1  ;;  %387 = vmatpush.msrb.mxu1 %v2404_v2  ;;  %v2448_v2 = vld [vmem:[%s3595_s2 + $0x18] sm:$0xff] }
  0x2b   :  { %407 = vmatpush.msrb.mxu2 %v2412_v3  ;;  %427 = vmatpush.msrb.mxu3 %v2417_v4  ;;  %3714 = vst [vmem:[#allocation28_spill] sm:$0xff] %v2448_v2  ;;  %v35_v4 = vld [vmem:[%s3594_s0 + $0x30] sm:$0xff] }
  0x2c   :  { %1724 = vmatmul.msk.f32.gmra.mxu0 %vm51_vm1, %v34_v16  ;;  %1733 = vmatmul.msk.f32.gmra.mxu1 %vm51_vm1, %v34_v16 }
  0x2d   :  { %1742 = vmatmul.msk.f32.gmra.mxu2 %vm51_vm1, %v34_v16  ;;  %1751 = vmatmul.msk.f32.gmra.mxu3 %vm51_vm1, %v34_v16  ;;  %v36_v16 = vld [vmem:[%s3594_s0 + $0x38] sm:$0xff] }
  0x2e   :  { %368 = vmatpush.msrb.mxu0 %v2429_v30  ;;  %388 = vmatpush.msrb.mxu1 %v2434_v43 }
  0x2f   :  { %408 = vmatpush.msrb.mxu2 %v2443_v56  ;;  %428 = vmatpush.msrb.mxu3 %v2448_v2 }
  0x30   :  { %504 = vmatpush.msra.mxu0 %v2036_v5  ;;  %524 = vmatpush.msra.mxu1 %v2041_v6 }
  0x31   :  { %544 = vmatpush.msra.mxu2 %v2072_v11  ;;  %564 = vmatpush.msra.mxu3 %v2048_v7 }
  0x32   :  { %505 = vmatpush.msra.mxu0 %v2055_v8  ;;  %525 = vmatpush.msra.mxu1 %v2060_v9 }
  0x33   :  { %545 = vmatpush.msra.mxu2 %v2096_v15  ;;  %565 = vmatpush.msra.mxu3 %v2067_v10 }
  0x34   :  { %1725 = vmatmul.msk.f32.gmra.mxu0 %vm51_vm1, %v35_v4  ;;  %1734 = vmatmul.msk.f32.gmra.mxu1 %vm51_vm1, %v35_v4 }
  0x35   :  { %1743 = vmatmul.msk.f32.gmra.mxu2 %vm51_vm1, %v35_v4  ;;  %1752 = vmatmul.msk.f32.gmra.mxu3 %vm51_vm1, %v35_v4  ;;  %v1972_v4 = vmov 0.0  }
  0x36   :  { %506 = vmatpush.msra.mxu0 %v2078_v12  ;;  %526 = vmatpush.msra.mxu1 %v2083_v13 }
  0x37   :  { %546 = vmatpush.msra.mxu2 %v2106_v17  ;;  %566 = vmatpush.msra.mxu3 %v2091_v14 }
  0x38   :  { %507 = vmatpush.msra.mxu0 %v2113_v18  ;;  %527 = vmatpush.msra.mxu1 %v2118_v19 }
  0x39   :  { %547 = vmatpush.msra.mxu2 %v2132_v21  ;;  %567 = vmatpush.msra.mxu3 %v2127_v20 }
  0x3a   :  { %508 = vmatpush.msra.mxu0 %v2139_v22  ;;  %528 = vmatpush.msra.mxu1 %v2144_v23 }
  0x3b   :  { %548 = vmatpush.msra.mxu2 %v2156_v25  ;;  %568 = vmatpush.msra.mxu3 %v2151_v24 }
  0x3c   :  { %1726 = vmatmul.msk.f32.gmra.mxu0 %vm51_vm1, %v36_v16  ;;  %1735 = vmatmul.msk.f32.gmra.mxu1 %vm51_vm1, %v36_v16 }
  0x3d   :  { %1744 = vmatmul.msk.f32.gmra.mxu2 %vm51_vm1, %v36_v16  ;;  %1753 = vmatmul.msk.f32.gmra.mxu3 %vm51_vm1, %v36_v16  ;;  %v3715_v16 = vld [vmem:[#allocation22_spill] sm:$0xff] }
  0x3e   :  { %509 = vmatpush.msra.mxu0 %v2162_v26  ;;  %529 = vmatpush.msra.mxu1 %v2167_v27 }
  0x3f   :  { %549 = vmatpush.msra.mxu2 %v2180_v29  ;;  %569 = vmatpush.msra.mxu3 %v2175_v28 }
  0x40   :  { %510 = vmatpush.msra.mxu0 %v2192_v31  ;;  %530 = vmatpush.msra.mxu1 %v2197_v32 }
  0x41   :  { %550 = vmatpush.msra.mxu2 %v2211_v34  ;;  %570 = vmatpush.msra.mxu3 %v2206_v33 }
  0x42   :  { %511 = vmatpush.msra.mxu0 %v2218_v35  ;;  %531 = vmatpush.msra.mxu1 %v2223_v36 }
  0x43   :  { %551 = vmatpush.msra.mxu2 %v2235_v38  ;;  %571 = vmatpush.msra.mxu3 %v2230_v37 }
  0x44   :  { %369 = vmatmul.f32.vlgmr.msrb.gmra.mxu0 %v1972_v4  ;;  %389 = vmatmul.f32.vlgmr.msrb.gmra.mxu1 %v1972_v4 }
  0x45   :  { %409 = vmatmul.f32.vlgmr.msrb.gmra.mxu2 %v1972_v4  ;;  %429 = vmatmul.f32.vlgmr.msrb.gmra.mxu3 %v1972_v4  ;;  %v3716_v4 = vld [vmem:[#allocation24_spill] sm:$0xff] }
  0x46   :  { %512 = vmatpush.msra.mxu0 %v2241_v39  ;;  %532 = vmatpush.msra.mxu1 %v2246_v40 }
  0x47   :  { %552 = vmatpush.msra.mxu2 %v2259_v42  ;;  %572 = vmatpush.msra.mxu3 %v2254_v41 }
  0x48   :  { %513 = vmatpush.msra.mxu0 %v2271_v44  ;;  %533 = vmatpush.msra.mxu1 %v2276_v45 }
  0x49   :  { %553 = vmatpush.msra.mxu2 %v2290_v47  ;;  %573 = vmatpush.msra.mxu3 %v2285_v46 }
  0x4a   :  { %514 = vmatpush.msra.mxu0 %v2297_v48  ;;  %534 = vmatpush.msra.mxu1 %v2302_v49 }
  0x4b   :  { %554 = vmatpush.msra.mxu2 %v2314_v51  ;;  %574 = vmatpush.msra.mxu3 %v2309_v50 }
  0x4c   :  { %515 = vmatpush.msra.mxu0 %v2320_v52  ;;  %535 = vmatpush.msra.mxu1 %v2325_v53 }
  0x4d   :  { %555 = vmatpush.msra.mxu2 %v2338_v55  ;;  %575 = vmatpush.msra.mxu3 %v2333_v54 }
  0x4e   :  { %516 = vmatpush.msra.mxu0 %v2350_v57  ;;  %536 = vmatpush.msra.mxu1 %v2355_v58 }
  0x4f   :  { %556 = vmatpush.msra.mxu2 %v2369_v60  ;;  %576 = vmatpush.msra.mxu3 %v2364_v59 }
  0x50   :  { %517 = vmatpush.msra.mxu0 %v2376_v61  ;;  %537 = vmatpush.msra.mxu1 %v2381_v62 }
  0x51   :  { %557 = vmatpush.msra.mxu2 %v2393_v0  ;;  %577 = vmatpush.msra.mxu3 %v2388_v63 }
  0x52   :  { %518 = vmatpush.msra.mxu0 %v2399_v1  ;;  %538 = vmatpush.msra.mxu1 %v3715_v16 }
  0x53   :  { %558 = vmatpush.msra.mxu2 %v2412_v3  ;;  %578 = vmatpush.msra.mxu3 %v3716_v4 }
  0x54   :  { %519 = vmatpush.msra.mxu0 %v2429_v30  ;;  %539 = vmatpush.msra.mxu1 %v2434_v43 }
  0x55   :  { %559 = vmatpush.msra.mxu2 %v2443_v56  ;;  %579 = vmatpush.msra.mxu3 %v2448_v2 }
  0x56   :  { %655 = vmatpush.msrb.mxu0 %v2036_v5  ;;  %675 = vmatpush.msrb.mxu1 %v2041_v6 }
  0x57   :  { %695 = vmatpush.msrb.mxu2 %v2072_v11  ;;  %715 = vmatpush.msrb.mxu3 %v2048_v7 }
  0x58   :  { %656 = vmatpush.msrb.mxu0 %v2055_v8  ;;  %676 = vmatpush.msrb.mxu1 %v2060_v9 }
  0x59   :  { %696 = vmatpush.msrb.mxu2 %v2096_v15  ;;  %716 = vmatpush.msrb.mxu3 %v2067_v10 }
  0x5a   :  { %657 = vmatpush.msrb.mxu0 %v2078_v12  ;;  %677 = vmatpush.msrb.mxu1 %v2083_v13 }
  0x5b   :  { %697 = vmatpush.msrb.mxu2 %v2106_v17  ;;  %717 = vmatpush.msrb.mxu3 %v2091_v14 }
  0x5c   :  { %658 = vmatpush.msrb.mxu0 %v2113_v18  ;;  %678 = vmatpush.msrb.mxu1 %v2118_v19 }
  0x5d   :  { %698 = vmatpush.msrb.mxu2 %v2132_v21  ;;  %718 = vmatpush.msrb.mxu3 %v2127_v20 }
  0x5e   :  { %659 = vmatpush.msrb.mxu0 %v2139_v22  ;;  %679 = vmatpush.msrb.mxu1 %v2144_v23 }
  0x5f   :  { %699 = vmatpush.msrb.mxu2 %v2156_v25  ;;  %719 = vmatpush.msrb.mxu3 %v2151_v24 }
  0x60   :  { %660 = vmatpush.msrb.mxu0 %v2162_v26  ;;  %680 = vmatpush.msrb.mxu1 %v2167_v27 }
  0x61   :  { %700 = vmatpush.msrb.mxu2 %v2180_v29  ;;  %720 = vmatpush.msrb.mxu3 %v2175_v28 }
  0x62   :  { %661 = vmatpush.msrb.mxu0 %v2192_v31  ;;  %681 = vmatpush.msrb.mxu1 %v2197_v32 }
  0x63   :  { %701 = vmatpush.msrb.mxu2 %v2211_v34  ;;  %721 = vmatpush.msrb.mxu3 %v2206_v33 }
  0x64   :  { %662 = vmatpush.msrb.mxu0 %v2218_v35  ;;  %682 = vmatpush.msrb.mxu1 %v2223_v36 }
  0x65   :  { %702 = vmatpush.msrb.mxu2 %v2235_v38  ;;  %722 = vmatpush.msrb.mxu3 %v2230_v37 }
  0x66   :  { %663 = vmatpush.msrb.mxu0 %v2241_v39  ;;  %683 = vmatpush.msrb.mxu1 %v2246_v40 }
  0x67   :  { %703 = vmatpush.msrb.mxu2 %v2259_v42  ;;  %723 = vmatpush.msrb.mxu3 %v2254_v41 }
  0x68   :  { %664 = vmatpush.msrb.mxu0 %v2271_v44  ;;  %684 = vmatpush.msrb.mxu1 %v2276_v45 }
  0x69   :  { %704 = vmatpush.msrb.mxu2 %v2290_v47  ;;  %724 = vmatpush.msrb.mxu3 %v2285_v46 }
  0x6a   :  { %665 = vmatpush.msrb.mxu0 %v2297_v48  ;;  %685 = vmatpush.msrb.mxu1 %v2302_v49 }
  0x6b   :  { %705 = vmatpush.msrb.mxu2 %v2314_v51  ;;  %725 = vmatpush.msrb.mxu3 %v2309_v50 }
  0x6c   :  { %666 = vmatpush.msrb.mxu0 %v2320_v52  ;;  %686 = vmatpush.msrb.mxu1 %v2325_v53 }
  0x6d   :  { %706 = vmatpush.msrb.mxu2 %v2338_v55  ;;  %726 = vmatpush.msrb.mxu3 %v2333_v54 }
  0x6e   :  { %667 = vmatpush.msrb.mxu0 %v2350_v57  ;;  %687 = vmatpush.msrb.mxu1 %v2355_v58 }
  0x6f   :  { %707 = vmatpush.msrb.mxu2 %v2369_v60  ;;  %727 = vmatpush.msrb.mxu3 %v2364_v59 }
  0x70   :  { %668 = vmatpush.msrb.mxu0 %v2376_v61  ;;  %688 = vmatpush.msrb.mxu1 %v2381_v62 }
  0x71   :  { %708 = vmatpush.msrb.mxu2 %v2393_v0  ;;  %728 = vmatpush.msrb.mxu3 %v2388_v63 }
  0x72   :  { %669 = vmatpush.msrb.mxu0 %v2399_v1  ;;  %689 = vmatpush.msrb.mxu1 %v3715_v16  ;;  %v41_v1 = vld [vmem:[%s3596_s3] sm:$0xf] }
  0x73   :  { %709 = vmatpush.msrb.mxu2 %v2412_v3  ;;  %729 = vmatpush.msrb.mxu3 %v3716_v4  ;;  %v43_v63 = vperm.slane %v41_v1, 0  ;;  %v44_v16 = vperm.slane %v41_v1, 1 }
  0x74   :  { %670 = vmatpush.msrb.mxu0 %v2429_v30  ;;  %690 = vmatpush.msrb.mxu1 %v2434_v43 }
  0x75   :  { %710 = vmatpush.msrb.mxu2 %v2443_v56  ;;  %730 = vmatpush.msrb.mxu3 %v2448_v2  ;;  %v2609_v56 = vperm.slane %v41_v1, 2  ;;  %v46_v2 = vperm.slane %v41_v1, 3 }
  0x81   :  { %v106_v62 = vpop.f32.mrf.mxu0  ;;  %v147_v0 = vpop.f32.mrf.mxu1 }
  0x88   :  { %v2601_v61 = vpop.f32.mrf.mxu2  ;;  %v2603_v3 = vpop.f32.mrf.mxu3 }
  0x89   :  { %v109_v4 = vpop.f32.mrf.mxu0  ;;  %v150_v30 = vpop.f32.mrf.mxu1 }
  0x8a   :  { %v2605_v59 = vadd.f32 %v109_v4, %v43_v63  ;;  %v2607_v43 = vadd.f32 %v150_v30, %v44_v16 }
  0x8c   :  { %3717 = vst [vmem:[#allocation29_spill] sm:$0xff] %v2605_v59 }
  0x8d   :  { %3718 = vst [vmem:[#allocation30_spill] sm:$0xff] %v2607_v43 }
  0x90   :  { %v191_v60 = vpop.f32.mrf.mxu2  ;;  %v232_v58 = vpop.f32.mrf.mxu3 }
  0x91   :  { %v2612_v57 = vadd.f32 %v191_v60, %v2609_v56  ;;  %v2614_v54 = vadd.f32 %v232_v58, %v46_v2  ;;  %v112_v55 = vpop.f32.mrf.mxu0  ;;  %v153_v53 = vpop.f32.mrf.mxu1 }
  0x92   :  { %v2616_v52 = vadd.f32 %v112_v55, %v43_v63  ;;  %v2618_v50 = vadd.f32 %v153_v53, %v44_v16 }
  0x93   :  { %3719 = vst [vmem:[#allocation31_spill] sm:$0xff] %v2612_v57 }
  0x94   :  { %3720 = vst [vmem:[#allocation32_spill] sm:$0xff] %v2614_v54 }
  0x95   :  { %3721 = vst [vmem:[#allocation33_spill] sm:$0xff] %v2616_v52 }
  0x96   :  { %3722 = vst [vmem:[#allocation34_spill] sm:$0xff] %v2618_v50 }
  0x98   :  { %v194_v4 = vpop.f32.mrf.mxu2  ;;  %v235_v59 = vpop.f32.mrf.mxu3 }
  0x99   :  { %v2621_v30 = vadd.f32 %v194_v4, %v2609_v56  ;;  %v2623_v43 = vadd.f32 %v235_v59, %v46_v2  ;;  %v115_v1 = vpop.f32.mrf.mxu0  ;;  %v156_v51 = vpop.f32.mrf.mxu1 }
  0x9a   :  { %v2625_v49 = vadd.f32 %v115_v1, %v43_v63  ;;  %v2627_v60 = vadd.f32 %v156_v51, %v44_v16 }
  0x9b   :  { %3723 = vst [vmem:[#allocation35_spill] sm:$0xff] %v2621_v30 }
  0x9c   :  { %3724 = vst [vmem:[#allocation36_spill] sm:$0xff] %v2623_v43 }
  0x9d   :  { %3725 = vst [vmem:[#allocation37_spill] sm:$0xff] %v2625_v49 }
  0x9e   :  { %3726 = vst [vmem:[#allocation38_spill] sm:$0xff] %v2627_v60 }
  0xa0   :  { %v197_v58 = vpop.f32.mrf.mxu2  ;;  %v238_v57 = vpop.f32.mrf.mxu3 }
  0xa1   :  { %v2630_v55 = vadd.f32 %v197_v58, %v2609_v56  ;;  %v2632_v53 = vadd.f32 %v238_v57, %v46_v2  ;;  %v118_v50 = vpop.f32.mrf.mxu0  ;;  %v159_v52 = vpop.f32.mrf.mxu1 }
  0xa2   :  { %v2634_v54 = vadd.f32 %v118_v50, %v43_v63  ;;  %v2636_v4 = vadd.f32 %v159_v52, %v44_v16 }
  0xa3   :  { %3727 = vst [vmem:[#allocation39_spill] sm:$0xff] %v2630_v55 }
  0xa4   :  { %3728 = vst [vmem:[#allocation40_spill] sm:$0xff] %v2632_v53 }
  0xa5   :  { %3729 = vst [vmem:[#allocation41_spill] sm:$0xff] %v2634_v54 }
  0xa6   :  { %3730 = vst [vmem:[#allocation42_spill] sm:$0xff] %v2636_v4 }
  0xa8   :  { %v200_v59 = vpop.f32.mrf.mxu2  ;;  %v241_v30 = vpop.f32.mrf.mxu3 }
  0xa9   :  { %v2639_v1 = vadd.f32 %v200_v59, %v2609_v56  ;;  %v2641_v51 = vadd.f32 %v241_v30, %v46_v2  ;;  %v121_v60 = vpop.f32.mrf.mxu0  ;;  %v162_v49 = vpop.f32.mrf.mxu1 }
  0xaa   :  { %v2643_v43 = vadd.f32 %v121_v60, %v43_v63  ;;  %v2645_v58 = vadd.f32 %v162_v49, %v44_v16 }
  0xab   :  { %3731 = vst [vmem:[#allocation43_spill] sm:$0xff] %v2639_v1 }
  0xac   :  { %3732 = vst [vmem:[#allocation44_spill] sm:$0xff] %v2641_v51 }
  0xad   :  { %3733 = vst [vmem:[#allocation45_spill] sm:$0xff] %v2643_v43 }
  0xae   :  { %3734 = vst [vmem:[#allocation46_spill] sm:$0xff] %v2645_v58 }
  0xb0   :  { %v203_v57 = vpop.f32.mrf.mxu2  ;;  %v244_v55 = vpop.f32.mrf.mxu3 }
  0xb1   :  { %v2648_v50 = vadd.f32 %v203_v57, %v2609_v56  ;;  %v2650_v52 = vadd.f32 %v244_v55, %v46_v2  ;;  %v124_v4 = vpop.f32.mrf.mxu0  ;;  %v165_v54 = vpop.f32.mrf.mxu1  ;;  %v107_v55 = vadd.f32 %v106_v62, %v43_v63 }
  0xb2   :  { %v2652_v53 = vadd.f32 %v124_v4, %v43_v63  ;;  %v2654_v59 = vadd.f32 %v165_v54, %v44_v16 }
  0xb3   :  { %3735 = vst [vmem:[#allocation47_spill] sm:$0xff] %v2648_v50  ;;  %v148_v50 = vadd.f32 %v147_v0, %v44_v16 }
  0xb4   :  { %3736 = vst [vmem:[#allocation48_spill] sm:$0xff] %v2650_v52 }
  0xb5   :  { %3737 = vst [vmem:[#allocation49_spill] sm:$0xff] %v2652_v53 }
  0xb6   :  { %3738 = vst [vmem:[#allocation50_spill] sm:$0xff] %v2654_v59 }
  0xb8   :  { %v206_v30 = vpop.f32.mrf.mxu2  ;;  %v247_v1 = vpop.f32.mrf.mxu3 }
  0xb9   :  { %v2657_v60 = vadd.f32 %v206_v30, %v2609_v56  ;;  %v2659_v49 = vadd.f32 %v247_v1, %v46_v2  ;;  %v127_v58 = vpop.f32.mrf.mxu0  ;;  %v168_v43 = vpop.f32.mrf.mxu1 }
  0xba   :  { %v2661_v51 = vadd.f32 %v127_v58, %v43_v63  ;;  %v2663_v57 = vadd.f32 %v168_v43, %v44_v16  ;;  %v230_v58 = vadd.f32 %v2603_v3, %v46_v2 }
  0xbb   :  { %3739 = vst [vmem:[#allocation51_spill] sm:$0xff] %v2657_v60 }
  0xbc   :  { %3740 = vst [vmem:[#allocation52_spill] sm:$0xff] %v2659_v49 }
  0xbd   :  { %3741 = vst [vmem:[#allocation53_spill] sm:$0xff] %v2661_v51 }
  0xbe   :  { %3742 = vst [vmem:[#allocation54_spill] sm:$0xff] %v2663_v57 }
  0xc0   :  { %v209_v52 = vpop.f32.mrf.mxu2  ;;  %v250_v4 = vpop.f32.mrf.mxu3 }
  0xc1   :  { %v2666_v54 = vadd.f32 %v209_v52, %v2609_v56  ;;  %v2668_v59 = vadd.f32 %v250_v4, %v46_v2  ;;  %v370_v53 = vpop.f32.mrf.mxu0  ;;  %v390_v30 = vpop.f32.mrf.mxu1 }
  0xc2   :  { %v433_v60 = vadd.f32 %v370_v53, %v107_v55  ;;  %v434_v1 = vadd.f32 %v390_v30, %v148_v50  ;;  %v189_v53 = vadd.f32 %v2601_v61, %v2609_v56 }
  0xc3   :  { %3743 = vst [vmem:[#allocation55_spill] sm:$0xff] %v2666_v54 }
  0xc4   :  { %3744 = vst [vmem:[#allocation56_spill] sm:$0xff] %v2668_v59  ;;  %v1754_v49 = vmul.f32 -1.442695, %v433_v60  ;;  %v1755_v48 = vmul.f32 -1.442695, %v434_v1 }
  0xc6   :  { %1780 = vpow2.f32 %v1754_v49 }
  0xc7   :  { %1782 = vpow2.f32 %v1755_v48 }
  0xc8   :  { %v430_v43 = vpop.f32.mrf.mxu3  ;;  %v410_v4 = vpop.f32.mrf.mxu2 }
  0xc9   :  { %v436_v62 = vadd.f32 %v430_v43, %v230_v58  ;;  %v435_v49 = vadd.f32 %v410_v4, %v189_v53 }
  0xcb   :  { %v1756_v63 = vmul.f32 -1.442695, %v436_v62 }
  0xcc   :  { %v1781_v0 = vpop.eup %1780 }
  0xcd   :  { %v1783_v16 = vpop.eup %1782  ;;  %v440_v57 = vadd.f32 1.0, %v1781_v0  ;;  %1784 = vpow2.f32 %v1756_v63 }
  0xce   :  { %v459_v52 = vadd.f32 1.0, %v1783_v16 }
  0xcf   :  { %1786 = vrcp.f32 %v440_v57  ;;  %v452_v1 = vand.u32 2147483648, %v440_v57  ;;  %v450_v62 = vand.u32 2147483647, %v440_v57  ;;  %vm446_vm4 = vweird.f32 %v440_v57 }
  0xd0   :  { %1788 = vrcp.f32 %v459_v52  ;;  %v471_v58 = vand.u32 2147483648, %v459_v52  ;;  %v469_v0 = vand.u32 2147483647, %v459_v52  ;;  %vm465_vm5 = vweird.f32 %v459_v52 }
  0xd1   :  { %v453_v56 = vor.u32 1.1754944e-38, %v452_v1  ;;  %vm451_vm7 = vcmp.eq.f32.partialorder %v450_v62, 8.507059e+37 }
  0xd2   :  { %v472_v53 = vor.u32 1.1754944e-38, %v471_v58  ;;  %vm470_vm9 = vcmp.eq.f32.partialorder %v469_v0, 8.507059e+37 }
  0xd3   :  { %v1785_v54 = vpop.eup %1784 }
  0xd4   :  { %v479_v50 = vadd.f32 1.0, %v1785_v54 }
  0xd5   :  { %v1787_v60 = vpop.eup %1786 }
  0xd6   :  { %v1789_v2 = vpop.eup %1788  ;;  %v442_v48 = vmul.f32 %v1787_v60, %v440_v57  ;;  %1790 = vrcp.f32 %v479_v50  ;;  %vm447_vm2 = vweird.f32 %v1787_v60  ;;  %vm485_vm11 = vweird.f32 %v479_v50 }
  0xd7   :  { %v461_v3 = vmul.f32 %v1789_v2, %v459_v52  ;;  %1792 = vtanh.f32 %v435_v49  ;;  %vm466_vm3 = vweird.f32 %v1789_v2  ;;  %vm448_vm6 = vmor %vm446_vm4, %vm447_vm2  ;;  %v491_v52 = vand.u32 2147483648, %v479_v50 }
  0xd8   :  { %v443_v55 = vsub.f32 1.0, %v442_v48  ;;  %vm467_vm8 = vmor %vm465_vm5, %vm466_vm3 }
  0xd9   :  { %v462_v30 = vsub.f32 1.0, %v461_v3  ;;  %v492_v58 = vor.u32 1.1754944e-38, %v491_v52 }
  0xda   :  { %v444_v43 = vmul.f32 %v1787_v60, %v443_v55 }
  0xdb   :  { %v463_v63 = vmul.f32 %v1789_v2, %v462_v30 }
  0xdc   :  { %v1791_v16 = vpop.eup %1790  ;;  %v445_v61 = vadd.f32 %v1787_v60, %v444_v43 }
  0xdd   :  { %v464_v54 = vadd.f32 %v1789_v2, %v463_v63  ;;  %v481_v4 = vmul.f32 %v1791_v16, %v479_v50  ;;  %v1793_v49 = vpop.eup %1792  ;;  %vm486_vm10 = vweird.f32 %v1791_v16 }
  0xde   :  { %v449_v48 = vsel %vm448_vm6, %v1787_v60, %v445_v61  ;;  %v489_v60 = vand.u32 2147483647, %v479_v50  ;;  %vm487_vm12 = vmor %vm485_vm11, %vm486_vm10 }
  0xdf   :  { %v454_v3 = vsel %vm451_vm7, %v453_v56, %v449_v48  ;;  %v468_v55 = vsel %vm467_vm8, %v1789_v2, %v464_v54  ;;  %v482_v59 = vsub.f32 1.0, %v481_v4  ;;  %v3774_v56 = vld [vmem:[#allocation31_spill] sm:$0xff] }
  0xe0   :  { %v473_v30 = vsel %vm470_vm9, %v472_v53, %v468_v55  ;;  %v496_v51 = vmul.f32 %v1793_v49, %v454_v3  ;;  %vm490_vm13 = vcmp.eq.f32.partialorder %v489_v60, 8.507059e+37 }
  0xe1   :  { %v495_v46 = vmul.f32 0.0, %v473_v30  ;;  %v483_v47 = vmul.f32 %v1791_v16, %v482_v59 }
  0xe3   :  { %v2673_v43 = vadd.f32 %v496_v51, %v495_v46  ;;  %v484_v57 = vadd.f32 %v1791_v16, %v483_v47 }
  0xe5   :  { %1794 = vtanh.f32 %v2673_v43  ;;  %v488_v1 = vsel %vm487_vm12, %v1791_v16, %v484_v57 }
  0xe6   :  { %v493_v62 = vsel %vm490_vm13, %v492_v58, %v488_v1 }
  0xeb   :  { %v1795_v2 = vpop.eup %1794 }
  0xec   :  { %v499_v63 = vmul.f32 %v1795_v2, %v493_v62 }
  0xee   :  { %520 = vmatmul.f32.vlgmr.msra.gmra.mxu0 %v499_v63  ;;  %540 = vmatmul.f32.vlgmr.msra.gmra.mxu1 %v499_v63 }
  0xef   :  { %560 = vmatmul.f32.vlgmr.msra.gmra.mxu2 %v499_v63  ;;  %580 = vmatmul.f32.vlgmr.msra.gmra.mxu3 %v499_v63 }
  0xf0   :  { %806 = vmatpush.msra.mxu0 %v2036_v5  ;;  %826 = vmatpush.msra.mxu1 %v2041_v6  ;;  %v3745_v5 = vld [vmem:[#allocation4_spill] sm:$0xff]  ;;  %v3746_v6 = vld [vmem:[#allocation3_spill] sm:$0xff] }
  0xf1   :  { %846 = vmatpush.msra.mxu2 %v2072_v11  ;;  %866 = vmatpush.msra.mxu3 %v2048_v7  ;;  %v3747_v7 = vld [vmem:[#allocation5_spill] sm:$0xff] }
  0xf2   :  { %807 = vmatpush.msra.mxu0 %v2055_v8  ;;  %827 = vmatpush.msra.mxu1 %v2060_v9  ;;  %v3748_v8 = vld [vmem:[#allocation6_spill] sm:$0xff]  ;;  %v3749_v9 = vld [vmem:[#allocation8_spill] sm:$0xff]  ;;  %v3751_v11 = vld [vmem:[#allocation9_spill] sm:$0xff] }
  0xf3   :  { %847 = vmatpush.msra.mxu2 %v2096_v15  ;;  %867 = vmatpush.msra.mxu3 %v2067_v10  ;;  %v3750_v10 = vld [vmem:[#allocation7_spill] sm:$0xff]  ;;  %v3755_v15 = vld [vmem:[#allocation13_spill] sm:$0xff] }
  0xf4   :  { %808 = vmatpush.msra.mxu0 %v2078_v12  ;;  %828 = vmatpush.msra.mxu1 %v2083_v13  ;;  %v3752_v12 = vld [vmem:[#allocation10_spill] sm:$0xff]  ;;  %v3753_v13 = vld [vmem:[#allocation12_spill] sm:$0xff] }
  0xf5   :  { %848 = vmatpush.msra.mxu2 %v2106_v17  ;;  %868 = vmatpush.msra.mxu3 %v2091_v14  ;;  %v3754_v14 = vld [vmem:[#allocation11_spill] sm:$0xff]  ;;  %v3756_v17 = vld [vmem:[#allocation14_spill] sm:$0xff] }
  0xf6   :  { %809 = vmatpush.msra.mxu0 %v2113_v18  ;;  %829 = vmatpush.msra.mxu1 %v2118_v19  ;;  %v3757_v18 = vld [vmem:[#allocation16_spill] sm:$0xff]  ;;  %v3758_v19 = vld [vmem:[#allocation15_spill] sm:$0xff] }
  0xf7   :  { %849 = vmatpush.msra.mxu2 %v2132_v21  ;;  %869 = vmatpush.msra.mxu3 %v2127_v20  ;;  %v3759_v20 = vld [vmem:[#allocation17_spill] sm:$0xff]  ;;  %v3760_v21 = vld [vmem:[#allocation18_spill] sm:$0xff] }
  0xf8   :  { %810 = vmatpush.msra.mxu0 %v2139_v22  ;;  %830 = vmatpush.msra.mxu1 %v2144_v23  ;;  %v3761_v22 = vld [vmem:[#allocation20_spill] sm:$0xff]  ;;  %v3762_v23 = vld [vmem:[#allocation19_spill] sm:$0xff] }
  0xf9   :  { %850 = vmatpush.msra.mxu2 %v2156_v25  ;;  %870 = vmatpush.msra.mxu3 %v2151_v24  ;;  %v3763_v24 = vld [vmem:[#allocation21_spill] sm:$0xff]  ;;  %v3764_v25 = vld [vmem:[#allocation22_spill] sm:$0xff] }
  0xfa   :  { %811 = vmatpush.msra.mxu0 %v2162_v26  ;;  %831 = vmatpush.msra.mxu1 %v2167_v27  ;;  %v3765_v26 = vld [vmem:[#allocation23_spill] sm:$0xff]  ;;  %v3766_v27 = vld [vmem:[#allocation24_spill] sm:$0xff] }
  0xfb   :  { %851 = vmatpush.msra.mxu2 %v2180_v29  ;;  %871 = vmatpush.msra.mxu3 %v2175_v28  ;;  %v3767_v28 = vld [vmem:[#allocation25_spill] sm:$0xff]  ;;  %v3768_v29 = vld [vmem:[#allocation26_spill] sm:$0xff] }
  0xfc   :  { %812 = vmatpush.msra.mxu0 %v2192_v31  ;;  %832 = vmatpush.msra.mxu1 %v2197_v32  ;;  %v3769_v31 = vld [vmem:[#allocation27_spill] sm:$0xff]  ;;  %v3770_v32 = vld [vmem:[#allocation28_spill] sm:$0xff] }
  0xfd   :  { %852 = vmatpush.msra.mxu2 %v2211_v34  ;;  %872 = vmatpush.msra.mxu3 %v2206_v33 }
  0xfe   :  { %813 = vmatpush.msra.mxu0 %v2218_v35  ;;  %833 = vmatpush.msra.mxu1 %v2223_v36  ;;  %v3771_v35 = vld [vmem:[#allocation29_spill] sm:$0xff] }
  0xff   :  { %853 = vmatpush.msra.mxu2 %v2235_v38  ;;  %873 = vmatpush.msra.mxu3 %v2230_v37  ;;  %v3772_v37 = vld [vmem:[#allocation30_spill] sm:$0xff] }
 0x100   :  { %814 = vmatpush.msra.mxu0 %v2241_v39  ;;  %834 = vmatpush.msra.mxu1 %v2246_v40 }
 0x101   :  { %854 = vmatpush.msra.mxu2 %v2259_v42  ;;  %874 = vmatpush.msra.mxu3 %v2254_v41  ;;  %v3773_v42 = vld [vmem:[#allocation32_spill] sm:$0xff] }
 0x102   :  { %815 = vmatpush.msra.mxu0 %v2271_v44  ;;  %835 = vmatpush.msra.mxu1 %v2276_v45 }
 0x103   :  { %855 = vmatpush.msra.mxu2 %v3745_v5  ;;  %875 = vmatpush.msra.mxu3 %v3746_v6 }
 0x104   :  { %816 = vmatpush.msra.mxu0 %v3747_v7  ;;  %836 = vmatpush.msra.mxu1 %v3748_v8 }
 0x105   :  { %856 = vmatpush.msra.mxu2 %v3749_v9  ;;  %876 = vmatpush.msra.mxu3 %v3750_v10 }
 0x106   :  { %817 = vmatpush.msra.mxu0 %v3751_v11  ;;  %837 = vmatpush.msra.mxu1 %v3752_v12 }
 0x107   :  { %857 = vmatpush.msra.mxu2 %v3753_v13  ;;  %877 = vmatpush.msra.mxu3 %v3754_v14 }
 0x108   :  { %818 = vmatpush.msra.mxu0 %v3755_v15  ;;  %838 = vmatpush.msra.mxu1 %v3756_v17 }
 0x109   :  { %858 = vmatpush.msra.mxu2 %v3757_v18  ;;  %878 = vmatpush.msra.mxu3 %v3758_v19 }
 0x10a   :  { %819 = vmatpush.msra.mxu0 %v3759_v20  ;;  %839 = vmatpush.msra.mxu1 %v3760_v21 }
 0x10b   :  { %859 = vmatpush.msra.mxu2 %v3761_v22  ;;  %879 = vmatpush.msra.mxu3 %v3762_v23 }
 0x10c   :  { %820 = vmatpush.msra.mxu0 %v3763_v24  ;;  %840 = vmatpush.msra.mxu1 %v3764_v25 }
 0x10d   :  { %860 = vmatpush.msra.mxu2 %v3765_v26  ;;  %880 = vmatpush.msra.mxu3 %v3766_v27 }
 0x10e   :  { %821 = vmatpush.msra.mxu0 %v3767_v28  ;;  %841 = vmatpush.msra.mxu1 %v3768_v29 }
 0x10f   :  { %861 = vmatpush.msra.mxu2 %v3769_v31  ;;  %881 = vmatpush.msra.mxu3 %v3770_v32 }
 0x16b   :  { %v521_v33 = vpop.f32.mrf.mxu0  ;;  %v541_v34 = vpop.f32.mrf.mxu1 }
 0x16c   :  { %v584_v36 = vadd.f32 %v521_v33, %v3771_v35  ;;  %v585_v38 = vadd.f32 %v541_v34, %v3772_v37  ;;  %v2757_v33 = vld [vmem:[%s3595_s2 + $0x1e8] sm:$0xff]  ;;  %v2763_v34 = vld [vmem:[%s3595_s2 + $0x1f0] sm:$0xff]  ;;  %v2769_v35 = vld [vmem:[%s3595_s2 + $0x1f8] sm:$0xff] }
 0x16d   :  { %v2781_v37 = vld [vmem:[%s3595_s2 + $0x1c8] sm:$0xff] }
 0x16e   :  { %v1757_v39 = vmul.f32 -1.442695, %v584_v36  ;;  %v1758_v40 = vmul.f32 -1.442695, %v585_v38  ;;  %v2775_v36 = vld [vmem:[%s3595_s2 + $0x1c0] sm:$0xff]  ;;  %v2787_v38 = vld [vmem:[%s3595_s2 + $0x1d0] sm:$0xff] }
 0x170   :  { %1796 = vpow2.f32 %v1757_v39  ;;  %v2793_v39 = vld [vmem:[%s3595_s2 + $0x1d8] sm:$0xff] }
 0x171   :  { %1798 = vpow2.f32 %v1758_v40  ;;  %v2799_v40 = vld [vmem:[%s3595_s2 + $0x1a0] sm:$0xff] }
 0x172   :  { %v581_v41 = vpop.f32.mrf.mxu3  ;;  %v561_v50 = vpop.f32.mrf.mxu2 }
 0x173   :  { %v587_v44 = vadd.f32 %v581_v41, %v3773_v42  ;;  %v586_v54 = vadd.f32 %v561_v50, %v3774_v56  ;;  %v2805_v41 = vld [vmem:[%s3595_s2 + $0x1a8] sm:$0xff]  ;;  %v2811_v42 = vld [vmem:[%s3595_s2 + $0x1b0] sm:$0xff] }
 0x174   :  { %v2853_v50 = vld [vmem:[%s3595_s2 + $0x168] sm:$0xff] }
 0x175   :  { %v1759_v45 = vmul.f32 -1.442695, %v587_v44  ;;  %v2817_v44 = vld [vmem:[%s3595_s2 + $0x1b8] sm:$0xff]  ;;  %v2877_v56 = vld [vmem:[%s3595_s2 + $0x148] sm:$0xff] }
 0x176   :  { %v1797_v46 = vpop.eup %1796 }
 0x177   :  { %v1799_v47 = vpop.eup %1798  ;;  %v591_v51 = vadd.f32 1.0, %v1797_v46  ;;  %1800 = vpow2.f32 %v1759_v45  ;;  %v2823_v45 = vld [vmem:[%s3595_s2 + $0x180] sm:$0xff]  ;;  %v2829_v46 = vld [vmem:[%s3595_s2 + $0x188] sm:$0xff] }
 0x178   :  { %v610_v59 = vadd.f32 1.0, %v1799_v47  ;;  %v2835_v47 = vld [vmem:[%s3595_s2 + $0x190] sm:$0xff] }
 0x179   :  { %1802 = vrcp.f32 %v591_v51  ;;  %v603_v55 = vand.u32 2147483648, %v591_v51  ;;  %v601_v52 = vand.u32 2147483647, %v591_v51  ;;  %vm597_vm0 = vweird.f32 %v591_v51 }
 0x17a   :  { %1804 = vrcp.f32 %v610_v59  ;;  %v622_v30 = vand.u32 2147483648, %v610_v59  ;;  %v620_v1 = vand.u32 2147483647, %v610_v59  ;;  %vm616_vm1 = vweird.f32 %v610_v59 }
 0x17b   :  { %v604_v62 = vor.u32 1.1754944e-38, %v603_v55  ;;  %vm602_vm4 = vcmp.eq.f32.partialorder %v601_v52, 8.507059e+37  ;;  %v2919_v55 = vld [vmem:[%s3595_s2 + $0x100] sm:$0xff]  ;;  %v2937_v52 = vld [vmem:[%s3595_s2 + $0x118] sm:$0xff] }
 0x17c   :  { %v623_v6 = vor.u32 1.1754944e-38, %v622_v30  ;;  %vm621_vm5 = vcmp.eq.f32.partialorder %v620_v1, 8.507059e+37  ;;  %v2925_v30 = vld [vmem:[%s3595_s2 + $0x108] sm:$0xff] }
 0x17d   :  { %v1801_v0 = vpop.eup %1800  ;;  %v2949_v1 = vld [vmem:[%s3595_s2 + $0xe8] sm:$0xff] }
 0x17e   :  { %v630_v16 = vadd.f32 1.0, %v1801_v0  ;;  %v2859_v0 = vld [vmem:[%s3595_s2 + $0x170] sm:$0xff] }
 0x17f   :  { %v1803_v61 = vpop.eup %1802 }
 0x180   :  { %v1805_v4 = vpop.eup %1804  ;;  %v593_v53 = vmul.f32 %v1803_v61, %v591_v51  ;;  %1806 = vrcp.f32 %v630_v16  ;;  %vm598_vm14 = vweird.f32 %v1803_v61  ;;  %v642_v19 = vand.u32 2147483648, %v630_v16  ;;  %v2841_v51 = vld [vmem:[%s3595_s2 + $0x198] sm:$0xff] }
 0x181   :  { %v612_v48 = vmul.f32 %v1805_v4, %v610_v59  ;;  %1808 = vtanh.f32 %v586_v54  ;;  %vm617_vm15 = vweird.f32 %v1805_v4  ;;  %vm599_vm2 = vmor %vm597_vm0, %vm598_vm14  ;;  %vm636_vm7 = vweird.f32 %v630_v16  ;;  %v2847_v59 = vld [vmem:[%s3595_s2 + $0x160] sm:$0xff]  ;;  %v2883_v54 = vld [vmem:[%s3595_s2 + $0x150] sm:$0xff] }
 0x182   :  { %v594_v49 = vsub.f32 1.0, %v593_v53  ;;  %vm618_vm3 = vmor %vm616_vm1, %vm617_vm15  ;;  %v640_v20 = vand.u32 2147483647, %v630_v16  ;;  %v643_v22 = vor.u32 1.1754944e-38, %v642_v19  ;;  %v2895_v53 = vld [vmem:[%s3595_s2 + $0x120] sm:$0xff]  ;;  %v3051_v19 = vld [vmem:[%s3595_s2 + $0x70] sm:$0xff] }
 0x183   :  { %v613_v3 = vsub.f32 1.0, %v612_v48  ;;  %v2901_v48 = vld [vmem:[%s3595_s2 + $0x128] sm:$0xff]  ;;  %3787 = vst [vmem:[#allocation16_spill] sm:$0xff] %v3051_v19 }
 0x184   :  { %v595_v57 = vmul.f32 %v1803_v61, %v594_v49  ;;  %vm641_vm9 = vcmp.eq.f32.partialorder %v640_v20, 8.507059e+37  ;;  %v2907_v49 = vld [vmem:[%s3595_s2 + $0x130] sm:$0xff]  ;;  %v3057_v20 = vld [vmem:[%s3595_s2 + $0x78] sm:$0xff] }
 0x185   :  { %v614_v60 = vmul.f32 %v1805_v4, %v613_v3  ;;  %v2913_v3 = vld [vmem:[%s3595_s2 + $0x138] sm:$0xff]  ;;  %3788 = vst [vmem:[#allocation15_spill] sm:$0xff] %v3057_v20 }
 0x186   :  { %v1807_v58 = vpop.eup %1806  ;;  %v596_v2 = vadd.f32 %v1803_v61, %v595_v57  ;;  %v2931_v57 = vld [vmem:[%s3595_s2 + $0x110] sm:$0xff] }
 0x187   :  { %v615_v63 = vadd.f32 %v1805_v4, %v614_v60  ;;  %v632_v5 = vmul.f32 %v1807_v58, %v630_v16  ;;  %v1809_v8 = vpop.eup %1808  ;;  %vm637_vm6 = vweird.f32 %v1807_v58  ;;  %v2865_v16 = vld [vmem:[%s3595_s2 + $0x178] sm:$0xff]  ;;  %v2943_v60 = vld [vmem:[%s3595_s2 + $0xe0] sm:$0xff] }
 0x188   :  { %v600_v7 = vsel %vm599_vm2, %v1803_v61, %v596_v2  ;;  %vm638_vm8 = vmor %vm636_vm7, %vm637_vm6  ;;  %v2871_v61 = vld [vmem:[%s3595_s2 + $0x140] sm:$0xff]  ;;  %v2961_v2 = vld [vmem:[%s3595_s2 + $0xf8] sm:$0xff] }
 0x189   :  { %v605_v9 = vsel %vm602_vm4, %v604_v62, %v600_v7  ;;  %v619_v10 = vsel %vm618_vm3, %v1805_v4, %v615_v63  ;;  %v633_v11 = vsub.f32 1.0, %v632_v5  ;;  %v2889_v4 = vld [vmem:[%s3595_s2 + $0x158] sm:$0xff]  ;;  %v2967_v62 = vld [vmem:[%s3595_s2 + $0xc0] sm:$0xff]  ;;  %v2973_v63 = vld [vmem:[%s3595_s2 + $0xc8] sm:$0xff] }
 0x18a   :  { %v624_v12 = vsel %vm621_vm5, %v623_v6, %v619_v10  ;;  %v647_v13 = vmul.f32 %v1809_v8, %v605_v9  ;;  %v2979_v5 = vld [vmem:[%s3595_s2 + $0xd0] sm:$0xff]  ;;  %v2985_v6 = vld [vmem:[%s3595_s2 + $0xd8] sm:$0xff]  ;;  %v2991_v7 = vld [vmem:[%s3595_s2 + $0xa0] sm:$0xff] }
 0x18b   :  { %v646_v14 = vmul.f32 %v624_v12, %v2673_v43  ;;  %v634_v15 = vmul.f32 %v1807_v58, %v633_v11  ;;  %v2751_v43 = vld [vmem:[%s3595_s2 + $0x1e0] sm:$0xff]  ;;  %3775 = vst [vmem:[#allocation4_spill] sm:$0xff] %v2979_v5  ;;  %v2997_v8 = vld [vmem:[%s3595_s2 + $0xa8] sm:$0xff]  ;;  %v3003_v9 = vld [vmem:[%s3595_s2 + $0xb0] sm:$0xff] }
 0x18c   :  { %3776 = vst [vmem:[#allocation3_spill] sm:$0xff] %v2985_v6  ;;  %v3009_v10 = vld [vmem:[%s3595_s2 + $0xb8] sm:$0xff]  ;;  %v3015_v11 = vld [vmem:[%s3595_s2 + $0x80] sm:$0xff]  ;;  %v3021_v12 = vld [vmem:[%s3595_s2 + $0x88] sm:$0xff] }
 0x18d   :  { %v2745_v17 = vadd.f32 %v647_v13, %v646_v14  ;;  %v635_v18 = vadd.f32 %v1807_v58, %v634_v15  ;;  %3777 = vst [vmem:[#allocation5_spill] sm:$0xff] %v2991_v7  ;;  %v3027_v13 = vld [vmem:[%s3595_s2 + $0x90] sm:$0xff]  ;;  %v3033_v14 = vld [vmem:[%s3595_s2 + $0x98] sm:$0xff]  ;;  %v3039_v15 = vld [vmem:[%s3595_s2 + $0x60] sm:$0xff] }
 0x18e   :  { %3778 = vst [vmem:[#allocation6_spill] sm:$0xff] %v2997_v8 }
 0x18f   :  { %1810 = vtanh.f32 %v2745_v17  ;;  %v639_v21 = vsel %vm638_vm8, %v1807_v58, %v635_v18  ;;  %v2955_v58 = vld [vmem:[%s3595_s2 + $0xf0] sm:$0xff]  ;;  %3779 = vst [vmem:[#allocation8_spill] sm:$0xff] %v3003_v9  ;;  %v3045_v18 = vld [vmem:[%s3595_s2 + $0x68] sm:$0xff] }
 0x190   :  { %v644_v24 = vsel %vm641_vm9, %v643_v22, %v639_v21  ;;  %3780 = vst [vmem:[#allocation7_spill] sm:$0xff] %v3009_v10  ;;  %v3063_v21 = vld [vmem:[%s3595_s2 + $0x40] sm:$0xff]  ;;  %v3069_v22 = vld [vmem:[%s3595_s2 + $0x48] sm:$0xff] }
 0x191   :  { %3781 = vst [vmem:[#allocation9_spill] sm:$0xff] %v3015_v11 }
 0x192   :  { %3782 = vst [vmem:[#allocation10_spill] sm:$0xff] %v3021_v12 }
 0x193   :  { %3783 = vst [vmem:[#allocation12_spill] sm:$0xff] %v3027_v13 }
 0x194   :  { %3784 = vst [vmem:[#allocation11_spill] sm:$0xff] %v3033_v14 }
 0x195   :  { %v1811_v23 = vpop.eup %1810  ;;  %3785 = vst [vmem:[#allocation13_spill] sm:$0xff] %v3039_v15 }
 0x196   :  { %v650_v25 = vmul.f32 %v1811_v23, %v644_v24  ;;  %3786 = vst [vmem:[#allocation14_spill] sm:$0xff] %v3045_v18  ;;  %v3075_v23 = vld [vmem:[%s3595_s2 + $0x50] sm:$0xff]  ;;  %v3081_v24 = vld [vmem:[%s3595_s2 + $0x58] sm:$0xff] }
 0x197   :  { %3789 = vst [vmem:[#allocation17_spill] sm:$0xff] %v3063_v21 }
 0x198   :  { %671 = vmatmul.f32.vlgmr.msrb.gmra.mxu0 %v650_v25  ;;  %691 = vmatmul.f32.vlgmr.msrb.gmra.mxu1 %v650_v25  ;;  %3790 = vst [vmem:[#allocation18_spill] sm:$0xff] %v3069_v22 }
 0x199   :  { %711 = vmatmul.f32.vlgmr.msrb.gmra.mxu2 %v650_v25  ;;  %731 = vmatmul.f32.vlgmr.msrb.gmra.mxu3 %v650_v25  ;;  %3791 = vst [vmem:[#allocation20_spill] sm:$0xff] %v3075_v23  ;;  %v3087_v25 = vld [vmem:[%s3595_s2 + $0x20] sm:$0xff] }
 0x19a   :  { %957 = vmatpush.msrb.mxu0 %v2751_v43  ;;  %977 = vmatpush.msrb.mxu1 %v2757_v33  ;;  %3792 = vst [vmem:[#allocation19_spill] sm:$0xff] %v3081_v24 }
 0x19b   :  { %997 = vmatpush.msrb.mxu2 %v2763_v34  ;;  %1017 = vmatpush.msrb.mxu3 %v2769_v35  ;;  %3793 = vst [vmem:[#allocation21_spill] sm:$0xff] %v3087_v25 }
 0x19c   :  { %958 = vmatpush.msrb.mxu0 %v2775_v36  ;;  %978 = vmatpush.msrb.mxu1 %v2781_v37 }
 0x19d   :  { %998 = vmatpush.msrb.mxu2 %v2787_v38  ;;  %1018 = vmatpush.msrb.mxu3 %v2793_v39 }
 0x19e   :  { %959 = vmatpush.msrb.mxu0 %v2799_v40  ;;  %979 = vmatpush.msrb.mxu1 %v2805_v41 }
 0x19f   :  { %999 = vmatpush.msrb.mxu2 %v2811_v42  ;;  %1019 = vmatpush.msrb.mxu3 %v2817_v44 }
 0x1a0   :  { %960 = vmatpush.msrb.mxu0 %v2823_v45  ;;  %980 = vmatpush.msrb.mxu1 %v2829_v46 }
 0x1a1   :  { %1000 = vmatpush.msrb.mxu2 %v2835_v47  ;;  %1020 = vmatpush.msrb.mxu3 %v2841_v51 }
 0x1a2   :  { %961 = vmatpush.msrb.mxu0 %v2847_v59  ;;  %981 = vmatpush.msrb.mxu1 %v2853_v50 }
 0x1a3   :  { %1001 = vmatpush.msrb.mxu2 %v2859_v0  ;;  %1021 = vmatpush.msrb.mxu3 %v2865_v16 }
 0x1a4   :  { %962 = vmatpush.msrb.mxu0 %v2871_v61  ;;  %982 = vmatpush.msrb.mxu1 %v2877_v56 }
 0x1a5   :  { %1002 = vmatpush.msrb.mxu2 %v2883_v54  ;;  %1022 = vmatpush.msrb.mxu3 %v2889_v4 }
 0x1a6   :  { %963 = vmatpush.msrb.mxu0 %v2895_v53  ;;  %983 = vmatpush.msrb.mxu1 %v2901_v48 }
 0x1a7   :  { %1003 = vmatpush.msrb.mxu2 %v2907_v49  ;;  %1023 = vmatpush.msrb.mxu3 %v2913_v3 }
 0x1a8   :  { %964 = vmatpush.msrb.mxu0 %v2919_v55  ;;  %984 = vmatpush.msrb.mxu1 %v2925_v30 }
 0x1a9   :  { %1004 = vmatpush.msrb.mxu2 %v2931_v57  ;;  %1024 = vmatpush.msrb.mxu3 %v2937_v52 }
 0x1aa   :  { %965 = vmatpush.msrb.mxu0 %v2943_v60  ;;  %985 = vmatpush.msrb.mxu1 %v2949_v1 }
 0x1ab   :  { %1005 = vmatpush.msrb.mxu2 %v2955_v58  ;;  %1025 = vmatpush.msrb.mxu3 %v2961_v2 }
 0x1ac   :  { %966 = vmatpush.msrb.mxu0 %v2967_v62  ;;  %986 = vmatpush.msrb.mxu1 %v2973_v63 }
 0x1ad   :  { %1006 = vmatpush.msrb.mxu2 %v2979_v5  ;;  %1026 = vmatpush.msrb.mxu3 %v2985_v6 }
 0x1ae   :  { %967 = vmatpush.msrb.mxu0 %v2991_v7  ;;  %987 = vmatpush.msrb.mxu1 %v2997_v8 }
 0x1af   :  { %1007 = vmatpush.msrb.mxu2 %v3003_v9  ;;  %1027 = vmatpush.msrb.mxu3 %v3009_v10 }
 0x1b0   :  { %968 = vmatpush.msrb.mxu0 %v3015_v11  ;;  %988 = vmatpush.msrb.mxu1 %v3021_v12 }
 0x1b1   :  { %1008 = vmatpush.msrb.mxu2 %v3027_v13  ;;  %1028 = vmatpush.msrb.mxu3 %v3033_v14 }
 0x1b2   :  { %969 = vmatpush.msrb.mxu0 %v3039_v15  ;;  %989 = vmatpush.msrb.mxu1 %v3045_v18 }
 0x1b3   :  { %1009 = vmatpush.msrb.mxu2 %v3051_v19  ;;  %1029 = vmatpush.msrb.mxu3 %v3057_v20  ;;  %v3796_v20 = vld [vmem:[#allocation34_spill] sm:$0xff] }
 0x1b4   :  { %970 = vmatpush.msrb.mxu0 %v3063_v21  ;;  %990 = vmatpush.msrb.mxu1 %v3069_v22  ;;  %v3093_v22 = vld [vmem:[%s3595_s2 + $0x28] sm:$0xff] }
 0x1b5   :  { %1010 = vmatpush.msrb.mxu2 %v3075_v23  ;;  %1030 = vmatpush.msrb.mxu3 %v3081_v24  ;;  %3794 = vst [vmem:[#allocation22_spill] sm:$0xff] %v3093_v22  ;;  %v3795_v23 = vld [vmem:[#allocation33_spill] sm:$0xff] }
 0x1b6   :  { %971 = vmatpush.msrb.mxu0 %v3087_v25  ;;  %991 = vmatpush.msrb.mxu1 %v3093_v22 }
 0x1b7   :  { %1011 = vmatpush.msrb.mxu2 %v3765_v26  ;;  %1031 = vmatpush.msrb.mxu3 %v3766_v27  ;;  %v3797_v27 = vld [vmem:[#allocation36_spill] sm:$0xff] }
 0x1b8   :  { %972 = vmatpush.msrb.mxu0 %v3767_v28  ;;  %992 = vmatpush.msrb.mxu1 %v3768_v29 }
 0x1b9   :  { %1012 = vmatpush.msrb.mxu2 %v3769_v31  ;;  %1032 = vmatpush.msrb.mxu3 %v3770_v32 }
 0x215   :  { %v672_v25 = vpop.f32.mrf.mxu0  ;;  %v692_v24 = vpop.f32.mrf.mxu1 }
 0x216   :  { %v735_v21 = vadd.f32 %v672_v25, %v3795_v23  ;;  %v736_v19 = vadd.f32 %v692_v24, %v3796_v20  ;;  %v3798_v20 = vld [vmem:[#allocation35_spill] sm:$0xff] }
 0x218   :  { %v1760_v18 = vmul.f32 -1.442695, %v735_v21  ;;  %v1761_v22 = vmul.f32 -1.442695, %v736_v19 }
 0x21a   :  { %1812 = vpow2.f32 %v1760_v18 }
 0x21b   :  { %1814 = vpow2.f32 %v1761_v22 }
 0x21c   :  { %v732_v26 = vpop.f32.mrf.mxu3  ;;  %v712_v32 = vpop.f32.mrf.mxu2 }
 0x21d   :  { %v738_v15 = vadd.f32 %v732_v26, %v3797_v27  ;;  %v737_v21 = vadd.f32 %v712_v32, %v3798_v20 }
 0x21f   :  { %v1762_v28 = vmul.f32 -1.442695, %v738_v15 }
 0x220   :  { %v1813_v14 = vpop.eup %1812 }
 0x221   :  { %v1815_v29 = vpop.eup %1814  ;;  %v742_v13 = vadd.f32 1.0, %v1813_v14  ;;  %1816 = vpow2.f32 %v1762_v28 }
 0x222   :  { %v761_v31 = vadd.f32 1.0, %v1815_v29 }
 0x223   :  { %1818 = vrcp.f32 %v742_v13  ;;  %v754_v15 = vand.u32 2147483648, %v742_v13  ;;  %v752_v28 = vand.u32 2147483647, %v742_v13  ;;  %vm748_vm12 = vweird.f32 %v742_v13 }
 0x224   :  { %1820 = vrcp.f32 %v761_v31  ;;  %v773_v27 = vand.u32 2147483648, %v761_v31  ;;  %v771_v11 = vand.u32 2147483647, %v761_v31  ;;  %vm767_vm13 = vweird.f32 %v761_v31 }
 0x225   :  { %v755_v32 = vor.u32 1.1754944e-38, %v754_v15  ;;  %vm753_vm0 = vcmp.eq.f32.partialorder %v752_v28, 8.507059e+37 }
 0x226   :  { %vm772_vm1 = vcmp.eq.f32.partialorder %v771_v11, 8.507059e+37 }
 0x227   :  { %v1817_v12 = vpop.eup %1816 }
 0x228   :  { %v781_v23 = vadd.f32 1.0, %v1817_v12 }
 0x229   :  { %v1819_v25 = vpop.eup %1818 }
 0x22a   :  { %v1821_v19 = vpop.eup %1820  ;;  %v744_v18 = vmul.f32 %v1819_v25, %v742_v13  ;;  %1822 = vrcp.f32 %v781_v23  ;;  %vm749_vm10 = vweird.f32 %v1819_v25  ;;  %v793_v15 = vand.u32 2147483648, %v781_v23 }
 0x22b   :  { %v763_v22 = vmul.f32 %v1821_v19, %v761_v31  ;;  %1824 = vtanh.f32 %v737_v21  ;;  %vm768_vm11 = vweird.f32 %v1821_v19  ;;  %vm750_vm14 = vmor %vm748_vm12, %vm749_vm10  ;;  %vm787_vm3 = vweird.f32 %v781_v23 }
 0x22c   :  { %v745_v24 = vsub.f32 1.0, %v744_v18  ;;  %vm769_vm15 = vmor %vm767_vm13, %vm768_vm11  ;;  %v774_v18 = vor.u32 1.1754944e-38, %v773_v27  ;;  %v794_v28 = vor.u32 1.1754944e-38, %v793_v15  ;;  %v3817_v15 = vld [vmem:[#allocation21_spill] sm:$0xff] }
 0x22d   :  { %v764_v26 = vsub.f32 1.0, %v763_v22 }
 0x22e   :  { %v746_v14 = vmul.f32 %v1819_v25, %v745_v24 }
 0x22f   :  { %v765_v29 = vmul.f32 %v1821_v19, %v764_v26 }
 0x230   :  { %v1823_v10 = vpop.eup %1822  ;;  %v747_v12 = vadd.f32 %v1819_v25, %v746_v14 }
 0x231   :  { %v766_v20 = vadd.f32 %v1821_v19, %v765_v29  ;;  %v783_v9 = vmul.f32 %v1823_v10, %v781_v23  ;;  %v1825_v21 = vpop.eup %1824  ;;  %vm788_vm2 = vweird.f32 %v1823_v10  ;;  %v3806_v29 = vld [vmem:[#allocation10_spill] sm:$0xff] }
 0x232   :  { %v751_v22 = vsel %vm750_vm14, %v1819_v25, %v747_v12  ;;  %v791_v25 = vand.u32 2147483647, %v781_v23  ;;  %vm789_vm4 = vmor %vm787_vm3, %vm788_vm2  ;;  %v3805_v23 = vld [vmem:[#allocation9_spill] sm:$0xff]  ;;  %v3807_v12 = vld [vmem:[#allocation12_spill] sm:$0xff] }
 0x233   :  { %v756_v8 = vsel %vm753_vm0, %v755_v32, %v751_v22  ;;  %v770_v24 = vsel %vm769_vm15, %v1821_v19, %v766_v20  ;;  %v784_v7 = vsub.f32 1.0, %v783_v9  ;;  %v3808_v32 = vld [vmem:[#allocation11_spill] sm:$0xff]  ;;  %v3809_v20 = vld [vmem:[#allocation13_spill] sm:$0xff]  ;;  %v3811_v22 = vld [vmem:[#allocation16_spill] sm:$0xff] }
 0x234   :  { %v775_v26 = vsel %vm772_vm1, %v774_v18, %v770_v24  ;;  %v798_v6 = vmul.f32 %v1825_v21, %v756_v8  ;;  %vm792_vm5 = vcmp.eq.f32.partialorder %v791_v25, 8.507059e+37  ;;  %v3803_v8 = vld [vmem:[#allocation8_spill] sm:$0xff]  ;;  %v3810_v18 = vld [vmem:[#allocation14_spill] sm:$0xff]  ;;  %v3812_v21 = vld [vmem:[#allocation15_spill] sm:$0xff] }
 0x235   :  { %v797_v5 = vmul.f32 %v775_v26, %v2745_v17  ;;  %v785_v14 = vmul.f32 %v1823_v10, %v784_v7  ;;  %v3799_v17 = vld [vmem:[#allocation4_spill] sm:$0xff]  ;;  %v3802_v7 = vld [vmem:[#allocation6_spill] sm:$0xff]  ;;  %v3813_v24 = vld [vmem:[#allocation17_spill] sm:$0xff] }
 0x236   :  { %v3814_v26 = vld [vmem:[#allocation18_spill] sm:$0xff] }
 0x237   :  { %v3107_v13 = vadd.f32 %v798_v6, %v797_v5  ;;  %v786_v31 = vadd.f32 %v1823_v10, %v785_v14  ;;  %v3800_v5 = vld [vmem:[#allocation3_spill] sm:$0xff]  ;;  %v3801_v6 = vld [vmem:[#allocation5_spill] sm:$0xff]  ;;  %v3815_v14 = vld [vmem:[#allocation20_spill] sm:$0xff] }
 0x238   :  { %v3818_v25 = vld [vmem:[#allocation22_spill] sm:$0xff] }
 0x239   :  { %1826 = vtanh.f32 %v3107_v13  ;;  %v790_v27 = vsel %vm789_vm4, %v1823_v10, %v786_v31  ;;  %v3804_v10 = vld [vmem:[#allocation7_spill] sm:$0xff] }
 0x23a   :  { %v795_v9 = vsel %vm792_vm5, %v794_v28, %v790_v27  ;;  %v3816_v31 = vld [vmem:[#allocation19_spill] sm:$0xff]  ;;  %v3171_v27 = vld [vmem:[%s3595_s2 + $0x30] sm:$0xff]  ;;  %v3177_v28 = vld [vmem:[%s3595_s2 + $0x38] sm:$0xff] }
 0x23b   :  { %3819 = vst [vmem:[#allocation23_spill] sm:$0xff] %v3171_v27 }
 0x23c   :  { %3820 = vst [vmem:[#allocation24_spill] sm:$0xff] %v3177_v28 }
 0x23f   :  { %v1827_v11 = vpop.eup %1826 }
 0x240   :  { %v801_v19 = vmul.f32 %v1827_v11, %v795_v9  ;;  %v3183_v11 = vld [vmem:[%s3595_s2] sm:$0xff]  ;;  %v3189_v9 = vld [vmem:[%s3595_s2 + $0x8] sm:$0xff] }
 0x241   :  { %3821 = vst [vmem:[#allocation25_spill] sm:$0xff] %v3183_v11 }
 0x242   :  { %822 = vmatmul.f32.vlgmr.msra.gmra.mxu0 %v801_v19  ;;  %842 = vmatmul.f32.vlgmr.msra.gmra.mxu1 %v801_v19  ;;  %3822 = vst [vmem:[#allocation26_spill] sm:$0xff] %v3189_v9 }
 0x243   :  { %862 = vmatmul.f32.vlgmr.msra.gmra.mxu2 %v801_v19  ;;  %882 = vmatmul.f32.vlgmr.msra.gmra.mxu3 %v801_v19  ;;  %v3195_v19 = vld [vmem:[%s3595_s2 + $0x10] sm:$0xff] }
 0x244   :  { %1108 = vmatpush.msra.mxu0 %v2751_v43  ;;  %1128 = vmatpush.msra.mxu1 %v2757_v33  ;;  %3823 = vst [vmem:[#allocation27_spill] sm:$0xff] %v3195_v19 }
 0x245   :  { %1148 = vmatpush.msra.mxu2 %v2763_v34  ;;  %1168 = vmatpush.msra.mxu3 %v2769_v35 }
 0x246   :  { %1109 = vmatpush.msra.mxu0 %v2775_v36  ;;  %1129 = vmatpush.msra.mxu1 %v2781_v37 }
 0x247   :  { %1149 = vmatpush.msra.mxu2 %v2787_v38  ;;  %1169 = vmatpush.msra.mxu3 %v2793_v39 }
 0x248   :  { %1110 = vmatpush.msra.mxu0 %v2799_v40  ;;  %1130 = vmatpush.msra.mxu1 %v2805_v41 }
 0x249   :  { %1150 = vmatpush.msra.mxu2 %v2811_v42  ;;  %1170 = vmatpush.msra.mxu3 %v2817_v44 }
 0x24a   :  { %1111 = vmatpush.msra.mxu0 %v2823_v45  ;;  %1131 = vmatpush.msra.mxu1 %v2829_v46 }
 0x24b   :  { %1151 = vmatpush.msra.mxu2 %v2835_v47  ;;  %1171 = vmatpush.msra.mxu3 %v2841_v51 }
 0x24c   :  { %1112 = vmatpush.msra.mxu0 %v2847_v59  ;;  %1132 = vmatpush.msra.mxu1 %v2853_v50 }
 0x24d   :  { %1152 = vmatpush.msra.mxu2 %v2859_v0  ;;  %1172 = vmatpush.msra.mxu3 %v2865_v16 }
 0x24e   :  { %1113 = vmatpush.msra.mxu0 %v2871_v61  ;;  %1133 = vmatpush.msra.mxu1 %v2877_v56 }
 0x24f   :  { %1153 = vmatpush.msra.mxu2 %v2883_v54  ;;  %1173 = vmatpush.msra.mxu3 %v2889_v4 }
 0x250   :  { %1114 = vmatpush.msra.mxu0 %v2895_v53  ;;  %1134 = vmatpush.msra.mxu1 %v2901_v48 }
 0x251   :  { %1154 = vmatpush.msra.mxu2 %v2907_v49  ;;  %1174 = vmatpush.msra.mxu3 %v2913_v3 }
 0x252   :  { %1115 = vmatpush.msra.mxu0 %v2919_v55  ;;  %1135 = vmatpush.msra.mxu1 %v2925_v30 }
 0x253   :  { %1155 = vmatpush.msra.mxu2 %v2931_v57  ;;  %1175 = vmatpush.msra.mxu3 %v2937_v52 }
 0x254   :  { %1116 = vmatpush.msra.mxu0 %v2943_v60  ;;  %1136 = vmatpush.msra.mxu1 %v2949_v1 }
 0x255   :  { %1156 = vmatpush.msra.mxu2 %v2955_v58  ;;  %1176 = vmatpush.msra.mxu3 %v2961_v2 }
 0x256   :  { %1117 = vmatpush.msra.mxu0 %v2967_v62  ;;  %1137 = vmatpush.msra.mxu1 %v2973_v63 }
 0x257   :  { %1157 = vmatpush.msra.mxu2 %v3799_v17  ;;  %1177 = vmatpush.msra.mxu3 %v3800_v5 }
 0x258   :  { %1118 = vmatpush.msra.mxu0 %v3801_v6  ;;  %1138 = vmatpush.msra.mxu1 %v3802_v7 }
 0x259   :  { %1158 = vmatpush.msra.mxu2 %v3803_v8  ;;  %1178 = vmatpush.msra.mxu3 %v3804_v10 }
 0x25a   :  { %1119 = vmatpush.msra.mxu0 %v3805_v23  ;;  %1139 = vmatpush.msra.mxu1 %v3806_v29 }
 0x25b   :  { %1159 = vmatpush.msra.mxu2 %v3807_v12  ;;  %1179 = vmatpush.msra.mxu3 %v3808_v32 }
 0x25c   :  { %1120 = vmatpush.msra.mxu0 %v3809_v20  ;;  %1140 = vmatpush.msra.mxu1 %v3810_v18 }
 0x25d   :  { %1160 = vmatpush.msra.mxu2 %v3811_v22  ;;  %1180 = vmatpush.msra.mxu3 %v3812_v21  ;;  %v3827_v21 = vld [vmem:[#allocation40_spill] sm:$0xff] }
 0x25e   :  { %1121 = vmatpush.msra.mxu0 %v3813_v24  ;;  %1141 = vmatpush.msra.mxu1 %v3814_v26 }
 0x25f   :  { %1161 = vmatpush.msra.mxu2 %v3815_v14  ;;  %1181 = vmatpush.msra.mxu3 %v3816_v31  ;;  %v3826_v31 = vld [vmem:[#allocation38_spill] sm:$0xff] }
 0x260   :  { %1122 = vmatpush.msra.mxu0 %v3817_v15  ;;  %1142 = vmatpush.msra.mxu1 %v3818_v25  ;;  %v3825_v25 = vld [vmem:[#allocation37_spill] sm:$0xff] }
 0x261   :  { %1162 = vmatpush.msra.mxu2 %v3171_v27  ;;  %1182 = vmatpush.msra.mxu3 %v3177_v28  ;;  %v3201_v28 = vld [vmem:[%s3595_s2 + $0x18] sm:$0xff] }
 0x262   :  { %1123 = vmatpush.msra.mxu0 %v3183_v11  ;;  %1143 = vmatpush.msra.mxu1 %v3189_v9  ;;  %3824 = vst [vmem:[#allocation28_spill] sm:$0xff] %v3201_v28 }
 0x263   :  { %1163 = vmatpush.msra.mxu2 %v3195_v19  ;;  %1183 = vmatpush.msra.mxu3 %v3201_v28 }
 0x2bf   :  { %v823_v11 = vpop.f32.mrf.mxu0  ;;  %v843_v27 = vpop.f32.mrf.mxu1 }
 0x2c0   :  { %v886_v15 = vadd.f32 %v823_v11, %v3825_v25  ;;  %v887_v9 = vadd.f32 %v843_v27, %v3826_v31  ;;  %v3828_v31 = vld [vmem:[#allocation39_spill] sm:$0xff] }
 0x2c2   :  { %v1763_v14 = vmul.f32 -1.442695, %v886_v15  ;;  %v1764_v26 = vmul.f32 -1.442695, %v887_v9 }
 0x2c4   :  { %1828 = vpow2.f32 %v1763_v14 }
 0x2c5   :  { %1830 = vpow2.f32 %v1764_v26 }
 0x2c6   :  { %v883_v24 = vpop.f32.mrf.mxu3  ;;  %v863_v28 = vpop.f32.mrf.mxu2 }
 0x2c7   :  { %v889_v19 = vadd.f32 %v883_v24, %v3827_v21  ;;  %v888_v15 = vadd.f32 %v863_v28, %v3828_v31 }
 0x2c9   :  { %v1765_v22 = vmul.f32 -1.442695, %v889_v19 }
 0x2ca   :  { %v1829_v18 = vpop.eup %1828 }
 0x2cb   :  { %v1831_v20 = vpop.eup %1830  ;;  %v893_v32 = vadd.f32 1.0, %v1829_v18  ;;  %1832 = vpow2.f32 %v1765_v22 }
 0x2cc   :  { %v912_v12 = vadd.f32 1.0, %v1831_v20 }
 0x2cd   :  { %1834 = vrcp.f32 %v893_v32  ;;  %v905_v24 = vand.u32 2147483648, %v893_v32  ;;  %v903_v20 = vand.u32 2147483647, %v893_v32  ;;  %vm899_vm8 = vweird.f32 %v893_v32 }
 0x2ce   :  { %1836 = vrcp.f32 %v912_v12  ;;  %v924_v19 = vand.u32 2147483648, %v912_v12  ;;  %v922_v23 = vand.u32 2147483647, %v912_v12  ;;  %vm918_vm9 = vweird.f32 %v912_v12 }
 0x2cf   :  { %v906_v28 = vor.u32 1.1754944e-38, %v905_v24  ;;  %vm904_vm12 = vcmp.eq.f32.partialorder %v903_v20, 8.507059e+37 }
 0x2d0   :  { %vm923_vm13 = vcmp.eq.f32.partialorder %v922_v23, 8.507059e+37 }
 0x2d1   :  { %v1833_v29 = vpop.eup %1832 }
 0x2d2   :  { %v932_v25 = vadd.f32 1.0, %v1833_v29 }
 0x2d3   :  { %v1835_v11 = vpop.eup %1834 }
 0x2d4   :  { %v1837_v27 = vpop.eup %1836  ;;  %v895_v14 = vmul.f32 %v1835_v11, %v893_v32  ;;  %1838 = vrcp.f32 %v932_v25  ;;  %vm900_vm6 = vweird.f32 %v1835_v11  ;;  %v944_v24 = vand.u32 2147483648, %v932_v25 }
 0x2d5   :  { %v914_v26 = vmul.f32 %v1837_v27, %v912_v12  ;;  %1840 = vtanh.f32 %v888_v15  ;;  %vm919_vm7 = vweird.f32 %v1837_v27  ;;  %vm901_vm10 = vmor %vm899_vm8, %vm900_vm6  ;;  %vm938_vm15 = vweird.f32 %v932_v25 }
 0x2d6   :  { %v896_v9 = vsub.f32 1.0, %v895_v14  ;;  %vm920_vm11 = vmor %vm918_vm9, %vm919_vm7  ;;  %v925_v14 = vor.u32 1.1754944e-38, %v924_v19  ;;  %v945_v20 = vor.u32 1.1754944e-38, %v944_v24  ;;  %v3847_v24 = vld [vmem:[#allocation21_spill] sm:$0xff] }
 0x2d7   :  { %v915_v21 = vsub.f32 1.0, %v914_v26 }
 0x2d8   :  { %v897_v18 = vmul.f32 %v1835_v11, %v896_v9 }
 0x2d9   :  { %v916_v22 = vmul.f32 %v1837_v27, %v915_v21 }
 0x2da   :  { %v1839_v10 = vpop.eup %1838  ;;  %v898_v29 = vadd.f32 %v1835_v11, %v897_v18 }
 0x2db   :  { %v917_v31 = vadd.f32 %v1837_v27, %v916_v22  ;;  %v934_v8 = vmul.f32 %v1839_v10, %v932_v25  ;;  %v1841_v15 = vpop.eup %1840  ;;  %vm939_vm14 = vweird.f32 %v1839_v10  ;;  %v3836_v22 = vld [vmem:[#allocation10_spill] sm:$0xff] }
 0x2dc   :  { %v902_v26 = vsel %vm901_vm10, %v1835_v11, %v898_v29  ;;  %v942_v11 = vand.u32 2147483647, %v932_v25  ;;  %vm940_vm0 = vmor %vm938_vm15, %vm939_vm14  ;;  %v3835_v25 = vld [vmem:[#allocation9_spill] sm:$0xff]  ;;  %v3837_v29 = vld [vmem:[#allocation12_spill] sm:$0xff] }
 0x2dd   :  { %v907_v7 = vsel %vm904_vm12, %v906_v28, %v902_v26  ;;  %v921_v9 = vsel %vm920_vm11, %v1837_v27, %v917_v31  ;;  %v935_v6 = vsub.f32 1.0, %v934_v8  ;;  %v3838_v28 = vld [vmem:[#allocation11_spill] sm:$0xff]  ;;  %v3839_v31 = vld [vmem:[#allocation13_spill] sm:$0xff]  ;;  %v3841_v26 = vld [vmem:[#allocation16_spill] sm:$0xff] }
 0x2de   :  { %v926_v21 = vsel %vm923_vm13, %v925_v14, %v921_v9  ;;  %v949_v5 = vmul.f32 %v1841_v15, %v907_v7  ;;  %vm943_vm1 = vcmp.eq.f32.partialorder %v942_v11, 8.507059e+37  ;;  %v3833_v7 = vld [vmem:[#allocation8_spill] sm:$0xff]  ;;  %v3840_v14 = vld [vmem:[#allocation14_spill] sm:$0xff]  ;;  %v3842_v15 = vld [vmem:[#allocation15_spill] sm:$0xff] }
 0x2df   :  { %v948_v17 = vmul.f32 %v926_v21, %v3107_v13  ;;  %v936_v18 = vmul.f32 %v1839_v10, %v935_v6  ;;  %v3829_v13 = vld [vmem:[#allocation4_spill] sm:$0xff]  ;;  %v3832_v6 = vld [vmem:[#allocation6_spill] sm:$0xff]  ;;  %v3843_v9 = vld [vmem:[#allocation17_spill] sm:$0xff] }
 0x2e0   :  { %v3844_v21 = vld [vmem:[#allocation18_spill] sm:$0xff] }
 0x2e1   :  { %v3209_v32 = vadd.f32 %v949_v5, %v948_v17  ;;  %v937_v12 = vadd.f32 %v1839_v10, %v936_v18  ;;  %v3830_v17 = vld [vmem:[#allocation3_spill] sm:$0xff]  ;;  %v3831_v5 = vld [vmem:[#allocation5_spill] sm:$0xff]  ;;  %v3845_v18 = vld [vmem:[#allocation20_spill] sm:$0xff] }
 0x2e2   :  { %v3848_v11 = vld [vmem:[#allocation22_spill] sm:$0xff] }
 0x2e3   :  { %1842 = vtanh.f32 %v3209_v32  ;;  %v941_v19 = vsel %vm940_vm0, %v1839_v10, %v937_v12  ;;  %v3834_v10 = vld [vmem:[#allocation7_spill] sm:$0xff] }
 0x2e4   :  { %v946_v8 = vsel %vm943_vm1, %v945_v20, %v941_v19  ;;  %v3846_v12 = vld [vmem:[#allocation19_spill] sm:$0xff]  ;;  %v3850_v20 = vld [vmem:[#allocation24_spill] sm:$0xff] }
 0x2e5   :  { %v3849_v19 = vld [vmem:[#allocation23_spill] sm:$0xff] }
 0x2e9   :  { %v1843_v23 = vpop.eup %1842 }
 0x2ea   :  { %v952_v27 = vmul.f32 %v1843_v23, %v946_v8  ;;  %v3851_v23 = vld [vmem:[#allocation25_spill] sm:$0xff]  ;;  %v3852_v8 = vld [vmem:[#allocation26_spill] sm:$0xff] }
 0x2ec   :  { %973 = vmatmul.f32.vlgmr.msrb.gmra.mxu0 %v952_v27  ;;  %993 = vmatmul.f32.vlgmr.msrb.gmra.mxu1 %v952_v27 }
 0x2ed   :  { %1013 = vmatmul.f32.vlgmr.msrb.gmra.mxu2 %v952_v27  ;;  %1033 = vmatmul.f32.vlgmr.msrb.gmra.mxu3 %v952_v27  ;;  %v3853_v27 = vld [vmem:[#allocation27_spill] sm:$0xff] }
 0x2ee   :  { %1259 = vmatpush.msrb.mxu0 %v2751_v43  ;;  %1279 = vmatpush.msrb.mxu1 %v2757_v33 }
 0x2ef   :  { %1299 = vmatpush.msrb.mxu2 %v2763_v34  ;;  %1319 = vmatpush.msrb.mxu3 %v2769_v35 }
 0x2f0   :  { %1260 = vmatpush.msrb.mxu0 %v2775_v36  ;;  %1280 = vmatpush.msrb.mxu1 %v2781_v37 }
 0x2f1   :  { %1300 = vmatpush.msrb.mxu2 %v2787_v38  ;;  %1320 = vmatpush.msrb.mxu3 %v2793_v39 }
 0x2f2   :  { %1261 = vmatpush.msrb.mxu0 %v2799_v40  ;;  %1281 = vmatpush.msrb.mxu1 %v2805_v41 }
 0x2f3   :  { %1301 = vmatpush.msrb.mxu2 %v2811_v42  ;;  %1321 = vmatpush.msrb.mxu3 %v2817_v44 }
 0x2f4   :  { %1262 = vmatpush.msrb.mxu0 %v2823_v45  ;;  %1282 = vmatpush.msrb.mxu1 %v2829_v46 }
 0x2f5   :  { %1302 = vmatpush.msrb.mxu2 %v2835_v47  ;;  %1322 = vmatpush.msrb.mxu3 %v2841_v51 }
 0x2f6   :  { %1263 = vmatpush.msrb.mxu0 %v2847_v59  ;;  %1283 = vmatpush.msrb.mxu1 %v2853_v50 }
 0x2f7   :  { %1303 = vmatpush.msrb.mxu2 %v2859_v0  ;;  %1323 = vmatpush.msrb.mxu3 %v2865_v16 }
 0x2f8   :  { %1264 = vmatpush.msrb.mxu0 %v2871_v61  ;;  %1284 = vmatpush.msrb.mxu1 %v2877_v56 }
 0x2f9   :  { %1304 = vmatpush.msrb.mxu2 %v2883_v54  ;;  %1324 = vmatpush.msrb.mxu3 %v2889_v4 }
 0x2fa   :  { %1265 = vmatpush.msrb.mxu0 %v2895_v53  ;;  %1285 = vmatpush.msrb.mxu1 %v2901_v48 }
 0x2fb   :  { %1305 = vmatpush.msrb.mxu2 %v2907_v49  ;;  %1325 = vmatpush.msrb.mxu3 %v2913_v3 }
 0x2fc   :  { %1266 = vmatpush.msrb.mxu0 %v2919_v55  ;;  %1286 = vmatpush.msrb.mxu1 %v2925_v30 }
 0x2fd   :  { %1306 = vmatpush.msrb.mxu2 %v2931_v57  ;;  %1326 = vmatpush.msrb.mxu3 %v2937_v52 }
 0x2fe   :  { %1267 = vmatpush.msrb.mxu0 %v2943_v60  ;;  %1287 = vmatpush.msrb.mxu1 %v2949_v1 }
 0x2ff   :  { %1307 = vmatpush.msrb.mxu2 %v2955_v58  ;;  %1327 = vmatpush.msrb.mxu3 %v2961_v2 }
 0x300   :  { %1268 = vmatpush.msrb.mxu0 %v2967_v62  ;;  %1288 = vmatpush.msrb.mxu1 %v2973_v63 }
 0x301   :  { %1308 = vmatpush.msrb.mxu2 %v3829_v13  ;;  %1328 = vmatpush.msrb.mxu3 %v3830_v17 }
 0x302   :  { %1269 = vmatpush.msrb.mxu0 %v3831_v5  ;;  %1289 = vmatpush.msrb.mxu1 %v3832_v6 }
 0x303   :  { %1309 = vmatpush.msrb.mxu2 %v3833_v7  ;;  %1329 = vmatpush.msrb.mxu3 %v3834_v10 }
 0x304   :  { %1270 = vmatpush.msrb.mxu0 %v3835_v25  ;;  %1290 = vmatpush.msrb.mxu1 %v3836_v22 }
 0x305   :  { %1310 = vmatpush.msrb.mxu2 %v3837_v29  ;;  %1330 = vmatpush.msrb.mxu3 %v3838_v28 }
 0x306   :  { %1271 = vmatpush.msrb.mxu0 %v3839_v31  ;;  %1291 = vmatpush.msrb.mxu1 %v3840_v14 }
 0x307   :  { %1311 = vmatpush.msrb.mxu2 %v3841_v26  ;;  %1331 = vmatpush.msrb.mxu3 %v3842_v15  ;;  %v3855_v15 = vld [vmem:[#allocation41_spill] sm:$0xff]  ;;  %v3856_v26 = vld [vmem:[#allocation42_spill] sm:$0xff] }
 0x308   :  { %1272 = vmatpush.msrb.mxu0 %v3843_v9  ;;  %1292 = vmatpush.msrb.mxu1 %v3844_v21  ;;  %v3854_v9 = vld [vmem:[#allocation28_spill] sm:$0xff] }
 0x309   :  { %1312 = vmatpush.msrb.mxu2 %v3845_v18  ;;  %1332 = vmatpush.msrb.mxu3 %v3846_v12 }
 0x30a   :  { %1273 = vmatpush.msrb.mxu0 %v3847_v24  ;;  %1293 = vmatpush.msrb.mxu1 %v3848_v11 }
 0x30b   :  { %1313 = vmatpush.msrb.mxu2 %v3849_v19  ;;  %1333 = vmatpush.msrb.mxu3 %v3850_v20  ;;  %v3857_v20 = vld [vmem:[#allocation44_spill] sm:$0xff] }
 0x30c   :  { %1274 = vmatpush.msrb.mxu0 %v3851_v23  ;;  %1294 = vmatpush.msrb.mxu1 %v3852_v8 }
 0x30d   :  { %1314 = vmatpush.msrb.mxu2 %v3853_v27  ;;  %1334 = vmatpush.msrb.mxu3 %v3854_v9 }
 0x369   :  { %v974_v21 = vpop.f32.mrf.mxu0  ;;  %v994_v18 = vpop.f32.mrf.mxu1 }
 0x36a   :  { %v1037_v12 = vadd.f32 %v974_v21, %v3855_v15  ;;  %v1038_v24 = vadd.f32 %v994_v18, %v3856_v26  ;;  %v3858_v26 = vld [vmem:[#allocation43_spill] sm:$0xff] }
 0x36c   :  { %v1766_v14 = vmul.f32 -1.442695, %v1037_v12  ;;  %v1767_v11 = vmul.f32 -1.442695, %v1038_v24 }
 0x36e   :  { %1844 = vpow2.f32 %v1766_v14 }
 0x36f   :  { %1846 = vpow2.f32 %v1767_v11 }
 0x370   :  { %v1034_v19 = vpop.f32.mrf.mxu3  ;;  %v1014_v9 = vpop.f32.mrf.mxu2 }
 0x371   :  { %v1040_v31 = vadd.f32 %v1034_v19, %v3857_v20  ;;  %v1039_v18 = vadd.f32 %v1014_v9, %v3858_v26 }
 0x373   :  { %v1768_v23 = vmul.f32 -1.442695, %v1040_v31 }
 0x374   :  { %v1845_v28 = vpop.eup %1844 }
 0x375   :  { %v1847_v8 = vpop.eup %1846  ;;  %v1044_v29 = vadd.f32 1.0, %v1845_v28  ;;  %1848 = vpow2.f32 %v1768_v23 }
 0x376   :  { %v1063_v27 = vadd.f32 1.0, %v1847_v8 }
 0x377   :  { %1850 = vrcp.f32 %v1044_v29  ;;  %v1056_v31 = vand.u32 2147483648, %v1044_v29  ;;  %v1054_v23 = vand.u32 2147483647, %v1044_v29  ;;  %vm1050_vm4 = vweird.f32 %v1044_v29 }
 0x378   :  { %1852 = vrcp.f32 %v1063_v27  ;;  %v1075_v20 = vand.u32 2147483648, %v1063_v27  ;;  %v1073_v25 = vand.u32 2147483647, %v1063_v27  ;;  %vm1069_vm5 = vweird.f32 %v1063_v27 }
 0x379   :  { %v1057_v9 = vor.u32 1.1754944e-38, %v1056_v31  ;;  %vm1055_vm8 = vcmp.eq.f32.partialorder %v1054_v23, 8.507059e+37 }
 0x37a   :  { %vm1074_vm9 = vcmp.eq.f32.partialorder %v1073_v25, 8.507059e+37 }
 0x37b   :  { %v1849_v22 = vpop.eup %1848 }
 0x37c   :  { %v1083_v15 = vadd.f32 1.0, %v1849_v22 }
 0x37d   :  { %v1851_v21 = vpop.eup %1850 }
 0x37e   :  { %v1853_v12 = vpop.eup %1852  ;;  %v1046_v14 = vmul.f32 %v1851_v21, %v1044_v29  ;;  %1854 = vrcp.f32 %v1083_v15  ;;  %vm1051_vm2 = vweird.f32 %v1851_v21  ;;  %v1095_v31 = vand.u32 2147483648, %v1083_v15 }
 0x37f   :  { %v1065_v24 = vmul.f32 %v1853_v12, %v1063_v27  ;;  %1856 = vtanh.f32 %v1039_v18  ;;  %vm1070_vm3 = vweird.f32 %v1853_v12  ;;  %vm1052_vm6 = vmor %vm1050_vm4, %vm1051_vm2  ;;  %vm1089_vm11 = vweird.f32 %v1083_v15 }
 0x380   :  { %v1047_v11 = vsub.f32 1.0, %v1046_v14  ;;  %vm1071_vm7 = vmor %vm1069_vm5, %vm1070_vm3  ;;  %v1076_v14 = vor.u32 1.1754944e-38, %v1075_v20  ;;  %v1096_v23 = vor.u32 1.1754944e-38, %v1095_v31 }
 0x381   :  { %v1066_v19 = vsub.f32 1.0, %v1065_v24 }
 0x382   :  { %v1048_v28 = vmul.f32 %v1851_v21, %v1047_v11 }
 0x383   :  { %v1067_v8 = vmul.f32 %v1853_v12, %v1066_v19 }
 0x384   :  { %v1855_v10 = vpop.eup %1854  ;;  %v1049_v22 = vadd.f32 %v1851_v21, %v1048_v28 }
 0x385   :  { %v1068_v26 = vadd.f32 %v1853_v12, %v1067_v8  ;;  %v1085_v7 = vmul.f32 %v1855_v10, %v1083_v15  ;;  %v1857_v18 = vpop.eup %1856  ;;  %vm1090_vm10 = vweird.f32 %v1855_v10 }
 0x386   :  { %v1053_v24 = vsel %vm1052_vm6, %v1851_v21, %v1049_v22  ;;  %v1093_v21 = vand.u32 2147483647, %v1083_v15  ;;  %vm1091_vm12 = vmor %vm1089_vm11, %vm1090_vm10  ;;  %v3888_v22 = vld [vmem:[#allocation47_spill] sm:$0xff] }
 0x387   :  { %v1058_v6 = vsel %vm1055_vm8, %v1057_v9, %v1053_v24  ;;  %v1072_v11 = vsel %vm1071_vm7, %v1853_v12, %v1068_v26  ;;  %v1086_v5 = vsub.f32 1.0, %v1085_v7 }
 0x388   :  { %v1077_v19 = vsel %vm1074_vm9, %v1076_v14, %v1072_v11  ;;  %v1100_v17 = vmul.f32 %v1857_v18, %v1058_v6  ;;  %vm1094_vm13 = vcmp.eq.f32.partialorder %v1093_v21, 8.507059e+37 }
 0x389   :  { %v1099_v13 = vmul.f32 %v1077_v19, %v3209_v32  ;;  %v1087_v28 = vmul.f32 %v1855_v10, %v1086_v5 }
 0x38b   :  { %v3281_v29 = vadd.f32 %v1100_v17, %v1099_v13  ;;  %v1088_v27 = vadd.f32 %v1855_v10, %v1087_v28 }
 0x38d   :  { %1858 = vtanh.f32 %v3281_v29  ;;  %v1092_v20 = vsel %vm1091_vm12, %v1855_v10, %v1088_v27 }
 0x38e   :  { %v1097_v7 = vsel %vm1094_vm13, %v1096_v23, %v1092_v20 }
 0x393   :  { %v1859_v25 = vpop.eup %1858 }
 0x394   :  { %v1103_v12 = vmul.f32 %v1859_v25, %v1097_v7 }
 0x396   :  { %1124 = vmatmul.f32.vlgmr.msra.gmra.mxu0 %v1103_v12  ;;  %1144 = vmatmul.f32.vlgmr.msra.gmra.mxu1 %v1103_v12 }
 0x397   :  { %1164 = vmatmul.f32.vlgmr.msra.gmra.mxu2 %v1103_v12  ;;  %1184 = vmatmul.f32.vlgmr.msra.gmra.mxu3 %v1103_v12 }
 0x398   :  { %1410 = vmatpush.msra.mxu0 %v2751_v43  ;;  %1430 = vmatpush.msra.mxu1 %v2757_v33  ;;  %v3859_v43 = vld [vmem:[#allocation4_spill] sm:$0xff]  ;;  %v3860_v33 = vld [vmem:[#allocation3_spill] sm:$0xff] }
 0x399   :  { %1450 = vmatpush.msra.mxu2 %v2763_v34  ;;  %1470 = vmatpush.msra.mxu3 %v2769_v35  ;;  %v3861_v34 = vld [vmem:[#allocation5_spill] sm:$0xff]  ;;  %v3862_v35 = vld [vmem:[#allocation6_spill] sm:$0xff] }
 0x39a   :  { %1411 = vmatpush.msra.mxu0 %v2775_v36  ;;  %1431 = vmatpush.msra.mxu1 %v2781_v37  ;;  %v3863_v36 = vld [vmem:[#allocation8_spill] sm:$0xff]  ;;  %v3864_v37 = vld [vmem:[#allocation7_spill] sm:$0xff] }
 0x39b   :  { %1451 = vmatpush.msra.mxu2 %v2787_v38  ;;  %1471 = vmatpush.msra.mxu3 %v2793_v39  ;;  %v3865_v38 = vld [vmem:[#allocation9_spill] sm:$0xff]  ;;  %v3866_v39 = vld [vmem:[#allocation10_spill] sm:$0xff] }
 0x39c   :  { %1412 = vmatpush.msra.mxu0 %v2799_v40  ;;  %1432 = vmatpush.msra.mxu1 %v2805_v41  ;;  %v3867_v40 = vld [vmem:[#allocation12_spill] sm:$0xff]  ;;  %v3868_v41 = vld [vmem:[#allocation11_spill] sm:$0xff] }
 0x39d   :  { %1452 = vmatpush.msra.mxu2 %v2811_v42  ;;  %1472 = vmatpush.msra.mxu3 %v2817_v44  ;;  %v3869_v42 = vld [vmem:[#allocation13_spill] sm:$0xff]  ;;  %v3870_v44 = vld [vmem:[#allocation14_spill] sm:$0xff] }
 0x39e   :  { %1413 = vmatpush.msra.mxu0 %v2823_v45  ;;  %1433 = vmatpush.msra.mxu1 %v2829_v46  ;;  %v3871_v45 = vld [vmem:[#allocation16_spill] sm:$0xff]  ;;  %v3872_v46 = vld [vmem:[#allocation15_spill] sm:$0xff] }
 0x39f   :  { %1453 = vmatpush.msra.mxu2 %v2835_v47  ;;  %1473 = vmatpush.msra.mxu3 %v2841_v51  ;;  %v3873_v47 = vld [vmem:[#allocation17_spill] sm:$0xff]  ;;  %v3874_v51 = vld [vmem:[#allocation18_spill] sm:$0xff] }
 0x3a0   :  { %1414 = vmatpush.msra.mxu0 %v2847_v59  ;;  %1434 = vmatpush.msra.mxu1 %v2853_v50  ;;  %v3875_v59 = vld [vmem:[#allocation20_spill] sm:$0xff]  ;;  %v3876_v50 = vld [vmem:[#allocation19_spill] sm:$0xff] }
 0x3a1   :  { %1454 = vmatpush.msra.mxu2 %v2859_v0  ;;  %1474 = vmatpush.msra.mxu3 %v2865_v16  ;;  %v3877_v0 = vld [vmem:[#allocation21_spill] sm:$0xff]  ;;  %v3878_v16 = vld [vmem:[#allocation22_spill] sm:$0xff] }
 0x3a2   :  { %1415 = vmatpush.msra.mxu0 %v2871_v61  ;;  %1435 = vmatpush.msra.mxu1 %v2877_v56  ;;  %v3879_v61 = vld [vmem:[#allocation23_spill] sm:$0xff]  ;;  %v3880_v56 = vld [vmem:[#allocation24_spill] sm:$0xff] }
 0x3a3   :  { %1455 = vmatpush.msra.mxu2 %v2883_v54  ;;  %1475 = vmatpush.msra.mxu3 %v2889_v4  ;;  %v3881_v54 = vld [vmem:[#allocation25_spill] sm:$0xff]  ;;  %v3882_v4 = vld [vmem:[#allocation26_spill] sm:$0xff] }
 0x3a4   :  { %1416 = vmatpush.msra.mxu0 %v2895_v53  ;;  %1436 = vmatpush.msra.mxu1 %v2901_v48  ;;  %v3883_v53 = vld [vmem:[#allocation27_spill] sm:$0xff]  ;;  %v3884_v48 = vld [vmem:[#allocation28_spill] sm:$0xff] }
 0x3a5   :  { %1456 = vmatpush.msra.mxu2 %v2907_v49  ;;  %1476 = vmatpush.msra.mxu3 %v2913_v3 }
 0x3a6   :  { %1417 = vmatpush.msra.mxu0 %v2919_v55  ;;  %1437 = vmatpush.msra.mxu1 %v2925_v30  ;;  %v3885_v55 = vld [vmem:[#allocation45_spill] sm:$0xff] }
 0x3a7   :  { %1457 = vmatpush.msra.mxu2 %v2931_v57  ;;  %1477 = vmatpush.msra.mxu3 %v2937_v52  ;;  %v3886_v57 = vld [vmem:[#allocation46_spill] sm:$0xff] }
 0x3a8   :  { %1418 = vmatpush.msra.mxu0 %v2943_v60  ;;  %1438 = vmatpush.msra.mxu1 %v2949_v1 }
 0x3a9   :  { %1458 = vmatpush.msra.mxu2 %v2955_v58  ;;  %1478 = vmatpush.msra.mxu3 %v2961_v2  ;;  %v3887_v2 = vld [vmem:[#allocation48_spill] sm:$0xff] }
 0x3aa   :  { %1419 = vmatpush.msra.mxu0 %v2967_v62  ;;  %1439 = vmatpush.msra.mxu1 %v2973_v63 }
 0x3ab   :  { %1459 = vmatpush.msra.mxu2 %v3859_v43  ;;  %1479 = vmatpush.msra.mxu3 %v3860_v33 }
 0x3ac   :  { %1420 = vmatpush.msra.mxu0 %v3861_v34  ;;  %1440 = vmatpush.msra.mxu1 %v3862_v35 }
 0x3ad   :  { %1460 = vmatpush.msra.mxu2 %v3863_v36  ;;  %1480 = vmatpush.msra.mxu3 %v3864_v37 }
 0x3ae   :  { %1421 = vmatpush.msra.mxu0 %v3865_v38  ;;  %1441 = vmatpush.msra.mxu1 %v3866_v39 }
 0x3af   :  { %1461 = vmatpush.msra.mxu2 %v3867_v40  ;;  %1481 = vmatpush.msra.mxu3 %v3868_v41 }
 0x3b0   :  { %1422 = vmatpush.msra.mxu0 %v3869_v42  ;;  %1442 = vmatpush.msra.mxu1 %v3870_v44 }
 0x3b1   :  { %1462 = vmatpush.msra.mxu2 %v3871_v45  ;;  %1482 = vmatpush.msra.mxu3 %v3872_v46 }
 0x3b2   :  { %1423 = vmatpush.msra.mxu0 %v3873_v47  ;;  %1443 = vmatpush.msra.mxu1 %v3874_v51 }
 0x3b3   :  { %1463 = vmatpush.msra.mxu2 %v3875_v59  ;;  %1483 = vmatpush.msra.mxu3 %v3876_v50 }
 0x3b4   :  { %1424 = vmatpush.msra.mxu0 %v3877_v0  ;;  %1444 = vmatpush.msra.mxu1 %v3878_v16 }
 0x3b5   :  { %1464 = vmatpush.msra.mxu2 %v3879_v61  ;;  %1484 = vmatpush.msra.mxu3 %v3880_v56  ;;  %v3889_v56 = vld [vmem:[#allocation49_spill] sm:$0xff] }
 0x3b6   :  { %1425 = vmatpush.msra.mxu0 %v3881_v54  ;;  %1445 = vmatpush.msra.mxu1 %v3882_v4  ;;  %v3890_v4 = vld [vmem:[#allocation50_spill] sm:$0xff] }
 0x3b7   :  { %1465 = vmatpush.msra.mxu2 %v3883_v53  ;;  %1485 = vmatpush.msra.mxu3 %v3884_v48 }
 0x413   :  { %v1125_v49 = vpop.f32.mrf.mxu0  ;;  %v1145_v3 = vpop.f32.mrf.mxu1 }
 0x414   :  { %v1188_v30 = vadd.f32 %v1125_v49, %v3885_v55  ;;  %v1189_v52 = vadd.f32 %v1145_v3, %v3886_v57  ;;  %v3891_v55 = vld [vmem:[#allocation52_spill] sm:$0xff] }
 0x416   :  { %v1769_v60 = vmul.f32 -1.442695, %v1188_v30  ;;  %v1770_v1 = vmul.f32 -1.442695, %v1189_v52 }
 0x418   :  { %1860 = vpow2.f32 %v1769_v60 }
 0x419   :  { %1862 = vpow2.f32 %v1770_v1 }
 0x41a   :  { %v1185_v58 = vpop.f32.mrf.mxu3  ;;  %v1165_v6 = vpop.f32.mrf.mxu2 }
 0x41b   :  { %v1191_v62 = vadd.f32 %v1185_v58, %v3887_v2  ;;  %v1190_v9 = vadd.f32 %v1165_v6, %v3888_v22 }
 0x41d   :  { %v1771_v63 = vmul.f32 -1.442695, %v1191_v62 }
 0x41e   :  { %v1861_v32 = vpop.eup %1860 }
 0x41f   :  { %v1863_v13 = vpop.eup %1862  ;;  %v1195_v17 = vadd.f32 1.0, %v1861_v32  ;;  %1864 = vpow2.f32 %v1771_v63 }
 0x420   :  { %v1214_v5 = vadd.f32 1.0, %v1863_v13  ;;  %v3892_v13 = vld [vmem:[#allocation51_spill] sm:$0xff] }
 0x421   :  { %1866 = vrcp.f32 %v1195_v17  ;;  %v1207_v19 = vand.u32 2147483648, %v1195_v17  ;;  %v1205_v31 = vand.u32 2147483647, %v1195_v17  ;;  %vm1201_vm0 = vweird.f32 %v1195_v17 }
 0x422   :  { %1868 = vrcp.f32 %v1214_v5  ;;  %v1226_v28 = vand.u32 2147483648, %v1214_v5  ;;  %v1224_v20 = vand.u32 2147483647, %v1214_v5  ;;  %vm1220_vm1 = vweird.f32 %v1214_v5 }
 0x423   :  { %v1208_v7 = vor.u32 1.1754944e-38, %v1207_v19  ;;  %vm1206_vm4 = vcmp.eq.f32.partialorder %v1205_v31, 8.507059e+37 }
 0x424   :  { %v1227_v33 = vor.u32 1.1754944e-38, %v1226_v28  ;;  %vm1225_vm5 = vcmp.eq.f32.partialorder %v1224_v20, 8.507059e+37 }
 0x425   :  { %v1865_v10 = vpop.eup %1864 }
 0x426   :  { %v1234_v15 = vadd.f32 1.0, %v1865_v10 }
 0x427   :  { %v1867_v8 = vpop.eup %1866 }
 0x428   :  { %v1869_v26 = vpop.eup %1868  ;;  %v1197_v14 = vmul.f32 %v1867_v8, %v1195_v17  ;;  %1870 = vrcp.f32 %v1234_v15  ;;  %vm1202_vm14 = vweird.f32 %v1867_v8  ;;  %v1246_v46 = vand.u32 2147483648, %v1234_v15 }
 0x429   :  { %v1216_v24 = vmul.f32 %v1869_v26, %v1214_v5  ;;  %1872 = vtanh.f32 %v1190_v9  ;;  %vm1221_vm15 = vweird.f32 %v1869_v26  ;;  %vm1203_vm2 = vmor %vm1201_vm0, %vm1202_vm14  ;;  %vm1240_vm7 = vweird.f32 %v1234_v15 }
 0x42a   :  { %v1198_v18 = vsub.f32 1.0, %v1197_v14  ;;  %vm1222_vm3 = vmor %vm1220_vm1, %vm1221_vm15  ;;  %v1244_v47 = vand.u32 2147483647, %v1234_v15  ;;  %v1247_v59 = vor.u32 1.1754944e-38, %v1246_v46 }
 0x42b   :  { %v1217_v11 = vsub.f32 1.0, %v1216_v24 }
 0x42c   :  { %v1199_v27 = vmul.f32 %v1867_v8, %v1198_v18  ;;  %vm1245_vm9 = vcmp.eq.f32.partialorder %v1244_v47, 8.507059e+37  ;;  %v1588_v47 = vld [vmem:[%s3597_s4 + $0xf8] sm:$0xff] }
 0x42d   :  { %v1218_v21 = vmul.f32 %v1869_v26, %v1217_v11 }
 0x42e   :  { %v1871_v23 = vpop.eup %1870  ;;  %v1200_v25 = vadd.f32 %v1867_v8, %v1199_v27 }
 0x42f   :  { %v1219_v12 = vadd.f32 %v1869_v26, %v1218_v21  ;;  %v1236_v43 = vmul.f32 %v1871_v23, %v1234_v15  ;;  %v1873_v35 = vpop.eup %1872  ;;  %vm1241_vm6 = vweird.f32 %v1871_v23 }
 0x430   :  { %v1204_v34 = vsel %vm1203_vm2, %v1867_v8, %v1200_v25  ;;  %vm1242_vm8 = vmor %vm1240_vm7, %vm1241_vm6 }
 0x431   :  { %v1209_v36 = vsel %vm1206_vm4, %v1208_v7, %v1204_v34  ;;  %v1223_v37 = vsel %vm1222_vm3, %v1869_v26, %v1219_v12  ;;  %v1237_v38 = vsub.f32 1.0, %v1236_v43 }
 0x432   :  { %v1228_v39 = vsel %vm1225_vm5, %v1227_v33, %v1223_v37  ;;  %v1251_v40 = vmul.f32 %v1873_v35, %v1209_v36 }
 0x433   :  { %v1250_v41 = vmul.f32 %v1228_v39, %v3281_v29  ;;  %v1238_v42 = vmul.f32 %v1871_v23, %v1237_v38 }
 0x435   :  { %v3353_v44 = vadd.f32 %v1251_v40, %v1250_v41  ;;  %v1239_v45 = vadd.f32 %v1871_v23, %v1238_v42 }
 0x437   :  { %1874 = vtanh.f32 %v3353_v44  ;;  %v1243_v51 = vsel %vm1242_vm8, %v1871_v23, %v1239_v45 }
 0x438   :  { %v1248_v0 = vsel %vm1245_vm9, %v1247_v59, %v1243_v51  ;;  %v1585_v51 = vld [vmem:[%s3597_s4 + $0xe0] sm:$0xff]  ;;  %v1586_v59 = vld [vmem:[%s3597_s4 + $0xe8] sm:$0xff] }
 0x43d   :  { %v1875_v50 = vpop.eup %1874 }
 0x43e   :  { %v1254_v16 = vmul.f32 %v1875_v50, %v1248_v0  ;;  %v1583_v50 = vld [vmem:[%s3597_s4 + $0xd0] sm:$0xff]  ;;  %v1584_v0 = vld [vmem:[%s3597_s4 + $0xd8] sm:$0xff] }
 0x440   :  { %1275 = vmatmul.f32.vlgmr.msrb.gmra.mxu0 %v1254_v16  ;;  %1295 = vmatmul.f32.vlgmr.msrb.gmra.mxu1 %v1254_v16 }
 0x441   :  { %1315 = vmatmul.f32.vlgmr.msrb.gmra.mxu2 %v1254_v16  ;;  %1335 = vmatmul.f32.vlgmr.msrb.gmra.mxu3 %v1254_v16  ;;  %v1581_v16 = vld [vmem:[%s3597_s4 + $0xc0] sm:$0xff] }
 0x442   :  { %1615 = vmatpush.msrb.mxu1 %v1588_v47 }
 0x444   :  { %1616 = vmatpush.msrb.mxu1 %v1586_v59  ;;  %v1647_v59 = vld [vmem:[%s3598_s6 + $0x50] sm:$0xff] }
 0x446   :  { %1617 = vmatpush.msrb.mxu1 %v1584_v0 }
 0x4bd   :  { %v1276_v29 = vpop.f32.mrf.mxu0  ;;  %v1296_v61 = vpop.f32.mrf.mxu1 }
 0x4be   :  { %v1339_v54 = vadd.f32 %v1276_v29, %v3889_v56  ;;  %v1340_v53 = vadd.f32 %v1296_v61, %v3890_v4  ;;  %v1582_v29 = vld [vmem:[%s3597_s4 + $0xc8] sm:$0xff]  ;;  %v1579_v61 = vld [vmem:[%s3597_s4 + $0xb0] sm:$0xff]  ;;  %v1580_v56 = vld [vmem:[%s3597_s4 + $0xb8] sm:$0xff] }
 0x4bf   :  { %1618 = vmatpush.msrb.mxu1 %v1582_v29  ;;  %v1578_v4 = vld [vmem:[%s3597_s4 + $0xa8] sm:$0xff] }
 0x4c0   :  { %v1772_v48 = vmul.f32 -1.442695, %v1339_v54  ;;  %v1773_v49 = vmul.f32 -1.442695, %v1340_v53  ;;  %v1577_v54 = vld [vmem:[%s3597_s4 + $0xa0] sm:$0xff]  ;;  %v1575_v53 = vld [vmem:[%s3597_s4 + $0x90] sm:$0xff] }
 0x4c1   :  { %1619 = vmatpush.msrb.mxu1 %v1580_v56  ;;  %v1646_v29 = vld [vmem:[%s3598_s6 + $0x48] sm:$0xff] }
 0x4c2   :  { %1876 = vpow2.f32 %v1772_v48  ;;  %v1576_v48 = vld [vmem:[%s3597_s4 + $0x98] sm:$0xff] }
 0x4c3   :  { %1878 = vpow2.f32 %v1773_v49  ;;  %1620 = vmatpush.msrb.mxu1 %v1578_v4  ;;  %v1573_v49 = vld [vmem:[%s3597_s4 + $0x80] sm:$0xff] }
 0x4c4   :  { %v1336_v3 = vpop.f32.mrf.mxu3  ;;  %v1316_v2 = vpop.f32.mrf.mxu2 }
 0x4c5   :  { %v1342_v30 = vadd.f32 %v1336_v3, %v3891_v55  ;;  %v1341_v17 = vadd.f32 %v1316_v2, %v3892_v13  ;;  %1621 = vmatpush.msrb.mxu1 %v1576_v48  ;;  %v1574_v3 = vld [vmem:[%s3597_s4 + $0x88] sm:$0xff]  ;;  %v1571_v55 = vld [vmem:[%s3597_s4 + $0x70] sm:$0xff]  ;;  %v1568_v13 = vld [vmem:[%s3597_s4 + $0x58] sm:$0xff] }
 0x4c7   :  { %v1774_v57 = vmul.f32 -1.442695, %v1342_v30  ;;  %1622 = vmatpush.msrb.mxu1 %v1574_v3  ;;  %v1572_v30 = vld [vmem:[%s3597_s4 + $0x78] sm:$0xff]  ;;  %v1661_v3 = vld [vmem:[%s3598_s6 + $0xc0] sm:$0xff] }
 0x4c8   :  { %v1877_v52 = vpop.eup %1876 }
 0x4c9   :  { %v1879_v60 = vpop.eup %1878  ;;  %v1346_v1 = vadd.f32 1.0, %v1877_v52  ;;  %1880 = vpow2.f32 %v1774_v57  ;;  %1623 = vmatpush.msrb.mxu1 %v1572_v30  ;;  %v1569_v57 = vld [vmem:[%s3597_s4 + $0x60] sm:$0xff]  ;;  %v1570_v52 = vld [vmem:[%s3597_s4 + $0x68] sm:$0xff] }
 0x4ca   :  { %v1365_v58 = vadd.f32 1.0, %v1879_v60 }
 0x4cb   :  { %1882 = vrcp.f32 %v1346_v1  ;;  %v1358_v22 = vand.u32 2147483648, %v1346_v1  ;;  %v1356_v14 = vand.u32 2147483647, %v1346_v1  ;;  %vm1352_vm12 = vweird.f32 %v1346_v1  ;;  %1624 = vmatpush.msrb.mxu1 %v1570_v52 }
 0x4cc   :  { %1884 = vrcp.f32 %v1365_v58  ;;  %v1377_v9 = vand.u32 2147483648, %v1365_v58  ;;  %v1375_v18 = vand.u32 2147483647, %v1365_v58  ;;  %vm1371_vm13 = vweird.f32 %v1365_v58 }
 0x4cd   :  { %v1359_v28 = vor.u32 1.1754944e-38, %v1358_v22  ;;  %vm1357_vm0 = vcmp.eq.f32.partialorder %v1356_v14, 8.507059e+37  ;;  %1625 = vmatpush.msrb.mxu1 %v1568_v13  ;;  %v1561_v22 = vld [vmem:[%s3597_s4 + $0x20] sm:$0xff]  ;;  %v1559_v14 = vld [vmem:[%s3597_s4 + $0x10] sm:$0xff] }
 0x4ce   :  { %v1378_v21 = vor.u32 1.1754944e-38, %v1377_v9  ;;  %vm1376_vm1 = vcmp.eq.f32.partialorder %v1375_v18, 8.507059e+37  ;;  %v1562_v9 = vld [vmem:[%s3597_s4 + $0x28] sm:$0xff]  ;;  %v1643_v13 = vld [vmem:[%s3598_s6 + $0x30] sm:$0xff] }
 0x4cf   :  { %v1881_v62 = vpop.eup %1880  ;;  %v3895_v18 = vld [vmem:[#allocation56_spill] sm:$0xff] }
 0x4d0   :  { %v1385_v63 = vadd.f32 1.0, %v1881_v62  ;;  %v3894_v62 = vld [vmem:[#allocation54_spill] sm:$0xff] }
 0x4d1   :  { %v1883_v32 = vpop.eup %1882 }
 0x4d2   :  { %v1885_v5 = vpop.eup %1884  ;;  %v1348_v6 = vmul.f32 %v1883_v32, %v1346_v1  ;;  %1886 = vrcp.f32 %v1385_v63  ;;  %vm1353_vm10 = vweird.f32 %v1883_v32  ;;  %v1397_v38 = vand.u32 2147483648, %v1385_v63 }
 0x4d3   :  { %v1367_v10 = vmul.f32 %v1885_v5, %v1365_v58  ;;  %1888 = vtanh.f32 %v1341_v17  ;;  %vm1372_vm11 = vweird.f32 %v1885_v5  ;;  %vm1354_vm14 = vmor %vm1352_vm12, %vm1353_vm10  ;;  %vm1391_vm3 = vweird.f32 %v1385_v63  ;;  %v3893_v58 = vld [vmem:[#allocation53_spill] sm:$0xff] }
 0x4d4   :  { %v1349_v15 = vsub.f32 1.0, %v1348_v6  ;;  %vm1373_vm15 = vmor %vm1371_vm13, %vm1372_vm11  ;;  %v1395_v39 = vand.u32 2147483647, %v1385_v63  ;;  %v1398_v41 = vor.u32 1.1754944e-38, %v1397_v38  ;;  %v1565_v6 = vld [vmem:[%s3597_s4 + $0x40] sm:$0xff] }
 0x4d5   :  { %v1368_v8 = vsub.f32 1.0, %v1367_v10  ;;  %v1566_v10 = vld [vmem:[%s3597_s4 + $0x48] sm:$0xff]  ;;  %v1665_v38 = vld [vmem:[%s3598_s6 + $0xe0] sm:$0xff] }
 0x4d6   :  { %v1350_v26 = vmul.f32 %v1883_v32, %v1349_v15  ;;  %vm1396_vm5 = vcmp.eq.f32.partialorder %v1395_v39, 8.507059e+37  ;;  %1626 = vmatpush.msrb.mxu1 %v1566_v10  ;;  %v1563_v15 = vld [vmem:[%s3597_s4 + $0x30] sm:$0xff] }
 0x4d7   :  { %v1369_v24 = vmul.f32 %v1885_v5, %v1368_v8  ;;  %v1564_v8 = vld [vmem:[%s3597_s4 + $0x38] sm:$0xff] }
 0x4d8   :  { %v1887_v11 = vpop.eup %1886  ;;  %v1351_v19 = vadd.f32 %v1883_v32, %v1350_v26  ;;  %1627 = vmatpush.msrb.mxu1 %v1564_v8 }
 0x4d9   :  { %v1370_v27 = vadd.f32 %v1885_v5, %v1369_v24  ;;  %v1387_v31 = vmul.f32 %v1887_v11, %v1385_v63  ;;  %v1889_v23 = vpop.eup %1888  ;;  %vm1392_vm2 = vweird.f32 %v1887_v11  ;;  %v1560_v24 = vld [vmem:[%s3597_s4 + $0x18] sm:$0xff] }
 0x4da   :  { %v1355_v20 = vsel %vm1354_vm14, %v1883_v32, %v1351_v19  ;;  %vm1393_vm4 = vmor %vm1391_vm3, %vm1392_vm2  ;;  %v1567_v32 = vld [vmem:[%s3597_s4 + $0x50] sm:$0xff]  ;;  %1628 = vmatpush.msrb.mxu1 %v1562_v9  ;;  %v1557_v19 = vld [vmem:[%s3597_s4] sm:$0xff] }
 0x4db   :  { %v1360_v25 = vsel %vm1357_vm0, %v1359_v28, %v1355_v20  ;;  %v1374_v7 = vsel %vm1373_vm15, %v1885_v5, %v1370_v27  ;;  %v1388_v12 = vsub.f32 1.0, %v1387_v31  ;;  %v1558_v28 = vld [vmem:[%s3597_s4 + $0x8] sm:$0xff] }
 0x4dc   :  { %v1379_v43 = vsel %vm1376_vm1, %v1378_v21, %v1374_v7  ;;  %v1402_v33 = vmul.f32 %v1889_v23, %v1360_v25  ;;  %1629 = vmatpush.msrb.mxu1 %v1560_v24  ;;  %v1652_v25 = vld [vmem:[%s3598_s6 + $0x78] sm:$0xff]  ;;  %v1642_v9 = vld [vmem:[%s3598_s6 + $0x28] sm:$0xff] }
 0x4dd   :  { %v1401_v34 = vmul.f32 %v1379_v43, %v3353_v44  ;;  %v1389_v35 = vmul.f32 %v1887_v11, %v1388_v12  ;;  %v1587_v44 = vld [vmem:[%s3597_s4 + $0xf0] sm:$0xff]  ;;  %v1668_v7 = vld [vmem:[%s3598_s6 + $0xf8] sm:$0xff]  ;;  %1673 = vmatpush.msrb.mxu2 %v1652_v25 }
 0x4de   :  { %1595 = vmatpush.msrb.mxu0 %v1587_v44  ;;  %1630 = vmatpush.msrb.mxu1 %v1558_v28  ;;  %v1651_v12 = vld [vmem:[%s3598_s6 + $0x70] sm:$0xff] }
 0x4df   :  { %v3361_v36 = vadd.f32 %v1402_v33, %v1401_v34  ;;  %v1390_v37 = vadd.f32 %v1887_v11, %v1389_v35  ;;  %1693 = vmatpush.msrb.mxu3 %v1668_v7  ;;  %v1667_v43 = vld [vmem:[%s3598_s6 + $0xf0] sm:$0xff]  ;;  %v1650_v33 = vld [vmem:[%s3598_s6 + $0x68] sm:$0xff]  ;;  %1674 = vmatpush.msrb.mxu2 %v1651_v12 }
 0x4e0   :  { %1596 = vmatpush.msrb.mxu0 %v1585_v51  ;;  %v1666_v34 = vld [vmem:[%s3598_s6 + $0xe8] sm:$0xff] }
 0x4e1   :  { %1890 = vtanh.f32 %v3361_v36  ;;  %v1394_v40 = vsel %vm1393_vm4, %v1887_v11, %v1390_v37  ;;  %1694 = vmatpush.msrb.mxu3 %v1667_v43  ;;  %v1649_v37 = vld [vmem:[%s3598_s6 + $0x60] sm:$0xff]  ;;  %1675 = vmatpush.msrb.mxu2 %v1650_v33  ;;  %v1639_v43 = vld [vmem:[%s3598_s6 + $0x10] sm:$0xff] }
 0x4e2   :  { %v1399_v45 = vsel %vm1396_vm5, %v1398_v41, %v1394_v40  ;;  %1597 = vmatpush.msrb.mxu0 %v1583_v50  ;;  %v1648_v41 = vld [vmem:[%s3598_s6 + $0x58] sm:$0xff]  ;;  %v1663_v50 = vld [vmem:[%s3598_s6 + $0xd0] sm:$0xff] }
 0x4e3   :  { %1695 = vmatpush.msrb.mxu3 %v1666_v34  ;;  %1676 = vmatpush.msrb.mxu2 %v1649_v37  ;;  %v1655_v33 = vld [vmem:[%s3598_s6 + $0x90] sm:$0xff]  ;;  %v1638_v34 = vld [vmem:[%s3598_s6 + $0x8] sm:$0xff]  ;;  %v1637_v37 = vld [vmem:[%s3598_s6] sm:$0xff] }
 0x4e4   :  { %1598 = vmatpush.msrb.mxu0 %v1581_v16 }
 0x4e5   :  { %1696 = vmatpush.msrb.mxu3 %v1665_v38  ;;  %1677 = vmatpush.msrb.mxu2 %v1648_v41  ;;  %v1653_v38 = vld [vmem:[%s3598_s6 + $0x80] sm:$0xff] }
 0x4e6   :  { %1599 = vmatpush.msrb.mxu0 %v1579_v61  ;;  %v1662_v61 = vld [vmem:[%s3598_s6 + $0xc8] sm:$0xff] }
 0x4e7   :  { %v1891_v42 = vpop.eup %1890  ;;  %1678 = vmatpush.msrb.mxu2 %v1647_v59  ;;  %v1779_v59 = vld [vmem:[%s3599_s7] ss:$0 sm:$0xff] }
 0x4e8   :  { %v1405_v46 = vmul.f32 %v1891_v42, %v1399_v45  ;;  %1600 = vmatpush.msrb.mxu0 %v1577_v54  ;;  %v1664_v42 = vld [vmem:[%s3598_s6 + $0xd8] sm:$0xff] }
 0x4e9   :  { %1697 = vmatpush.msrb.mxu3 %v1664_v42  ;;  %1679 = vmatpush.msrb.mxu2 %v1646_v29 }
 0x4ea   :  { %1426 = vmatmul.f32.vlgmr.msra.gmra.mxu0 %v1405_v46  ;;  %1446 = vmatmul.f32.vlgmr.msra.gmra.mxu1 %v1405_v46 }
 0x4eb   :  { %1466 = vmatmul.f32.vlgmr.msra.gmra.mxu2 %v1405_v46  ;;  %1486 = vmatmul.f32.vlgmr.msra.gmra.mxu3 %v1405_v46  ;;  %v3896_v46 = vld [vmem:[#allocation55_spill] sm:$0xff] }
 0x4ec   :  { %1601 = vmatpush.msrb.mxu0 %v1575_v53  ;;  %1698 = vmatpush.msrb.mxu3 %v1663_v50 }
 0x4ee   :  { %1602 = vmatpush.msrb.mxu0 %v1573_v49  ;;  %v1645_v49 = vld [vmem:[%s3598_s6 + $0x40] sm:$0xff]  ;;  %1699 = vmatpush.msrb.mxu3 %v1662_v61 }
 0x4ef   :  { %1680 = vmatpush.msrb.mxu2 %v1645_v49 }
 0x4f0   :  { %1603 = vmatpush.msrb.mxu0 %v1571_v55  ;;  %1700 = vmatpush.msrb.mxu3 %v1661_v3 }
 0x4f2   :  { %1604 = vmatpush.msrb.mxu0 %v1569_v57 }
 0x4f4   :  { %1605 = vmatpush.msrb.mxu0 %v1567_v32 }
 0x4f6   :  { %1606 = vmatpush.msrb.mxu0 %v1565_v6 }
 0x4f8   :  { %1607 = vmatpush.msrb.mxu0 %v1563_v15 }
 0x4fa   :  { %1608 = vmatpush.msrb.mxu0 %v1561_v22 }
 0x4fc   :  { %1609 = vmatpush.msrb.mxu0 %v1559_v14 }
 0x4fe   :  { %1610 = vmatpush.msrb.mxu0 %v1557_v19 }
 0x567   :  { %v1427_v60 = vpop.f32.mrf.mxu0  ;;  %v1447_v1 = vpop.f32.mrf.mxu1 }
 0x568   :  { %v1490_v2 = vadd.f32 %v1427_v60, %v3893_v58  ;;  %v1491_v63 = vadd.f32 %v1447_v1, %v3894_v62  ;;  %v1644_v60 = vld [vmem:[%s3598_s6 + $0x38] sm:$0xff] }
 0x569   :  { %v1660_v1 = vld [vmem:[%s3598_s6 + $0xb8] sm:$0xff]  ;;  %1681 = vmatpush.msrb.mxu2 %v1644_v60 }
 0x56a   :  { %v1775_v17 = vmul.f32 -1.442695, %v1490_v2  ;;  %v1776_v5 = vmul.f32 -1.442695, %v1491_v63  ;;  %1701 = vmatpush.msrb.mxu3 %v1660_v1 }
 0x56b   :  { %1682 = vmatpush.msrb.mxu2 %v1643_v13 }
 0x56c   :  { %1892 = vpow2.f32 %v1775_v17  ;;  %v1659_v17 = vld [vmem:[%s3598_s6 + $0xb0] sm:$0xff] }
 0x56d   :  { %1894 = vpow2.f32 %v1776_v5  ;;  %1702 = vmatpush.msrb.mxu3 %v1659_v17  ;;  %1683 = vmatpush.msrb.mxu2 %v1642_v9 }
 0x56e   :  { %v1487_v26 = vpop.f32.mrf.mxu3  ;;  %v1467_v35 = vpop.f32.mrf.mxu2 }
 0x56f   :  { %v1493_v11 = vadd.f32 %v1487_v26, %v3895_v18  ;;  %v1492_v44 = vadd.f32 %v1467_v35, %v3896_v46  ;;  %v1658_v26 = vld [vmem:[%s3598_s6 + $0xa8] sm:$0xff]  ;;  %v1641_v18 = vld [vmem:[%s3598_s6 + $0x20] sm:$0xff] }
 0x570   :  { %1703 = vmatpush.msrb.mxu3 %v1658_v26  ;;  %1684 = vmatpush.msrb.mxu2 %v1641_v18  ;;  %v1654_v35 = vld [vmem:[%s3598_s6 + $0x88] sm:$0xff] }
 0x571   :  { %v1777_v27 = vmul.f32 -1.442695, %v1493_v11  ;;  %v1657_v11 = vld [vmem:[%s3598_s6 + $0xa0] sm:$0xff] }
 0x572   :  { %v1893_v31 = vpop.eup %1892  ;;  %1704 = vmatpush.msrb.mxu3 %v1657_v11 }
 0x573   :  { %v1895_v21 = vpop.eup %1894  ;;  %v3463_v20 = vadd.f32 1.0, %v1893_v31  ;;  %1896 = vpow2.f32 %v1777_v27  ;;  %v1656_v27 = vld [vmem:[%s3598_s6 + $0x98] sm:$0xff] }
 0x574   :  { %v3465_v23 = vadd.f32 1.0, %v1895_v21  ;;  %1705 = vmatpush.msrb.mxu3 %v1656_v27 }
 0x575   :  { %1898 = vrcp.f32 %v3463_v20  ;;  %v1509_v54 = vand.u32 2147483648, %v3463_v20  ;;  %v1507_v48 = vand.u32 2147483647, %v3463_v20  ;;  %vm1503_vm8 = vweird.f32 %v3463_v20 }
 0x576   :  { %1900 = vrcp.f32 %v3465_v23  ;;  %v1528_v4 = vand.u32 2147483648, %v3465_v23  ;;  %v1526_v30 = vand.u32 2147483647, %v3465_v23  ;;  %vm1522_vm9 = vweird.f32 %v3465_v23  ;;  %1706 = vmatpush.msrb.mxu3 %v1655_v33 }
 0x577   :  { %v1510_v58 = vor.u32 1.1754944e-38, %v1509_v54  ;;  %vm1508_vm12 = vcmp.eq.f32.partialorder %v1507_v48, 8.507059e+37 }
 0x578   :  { %v1529_v63 = vor.u32 1.1754944e-38, %v1528_v4  ;;  %vm1527_vm13 = vcmp.eq.f32.partialorder %v1526_v30, 8.507059e+37  ;;  %1707 = vmatpush.msrb.mxu3 %v1654_v35 }
 0x579   :  { %v1897_v39 = vpop.eup %1896 }
 0x57a   :  { %v3493_v40 = vadd.f32 1.0, %v1897_v39  ;;  %1708 = vmatpush.msrb.mxu3 %v1653_v38  ;;  %v1589_v39 = vld [vmem:[%s3600_s5] sm:$0x3] }
 0x57b   :  { %v1899_v45 = vpop.eup %1898  ;;  %v1592_v41 = vperm.slane %v1589_v39, 1 }
 0x57c   :  { %v1901_v47 = vpop.eup %1900  ;;  %v1499_v51 = vmul.f32 %v1899_v45, %v3463_v20  ;;  %1902 = vrcp.f32 %v3493_v40  ;;  %vm1504_vm6 = vweird.f32 %v1899_v45  ;;  %v1548_v31 = vand.u32 2147483648, %v3493_v40 }
 0x57d   :  { %v1518_v0 = vmul.f32 %v1901_v47, %v3465_v23  ;;  %1904 = vtanh.f32 %v1492_v44  ;;  %vm1523_vm7 = vweird.f32 %v1901_v47  ;;  %vm1505_vm10 = vmor %vm1503_vm8, %vm1504_vm6  ;;  %vm1542_vm15 = vweird.f32 %v3493_v40 }
 0x57e   :  { %v1500_v16 = vsub.f32 1.0, %v1499_v51  ;;  %vm1524_vm11 = vmor %vm1522_vm9, %vm1523_vm7  ;;  %v1546_v21 = vand.u32 2147483647, %v3493_v40  ;;  %v1549_v23 = vor.u32 1.1754944e-38, %v1548_v31 }
 0x57f   :  { %v1519_v56 = vsub.f32 1.0, %v1518_v0 }
 0x580   :  { %v1501_v53 = vmul.f32 %v1899_v45, %v1500_v16  ;;  %vm1547_vm1 = vcmp.eq.f32.partialorder %v1546_v21, 8.507059e+37 }
 0x581   :  { %v1520_v55 = vmul.f32 %v1901_v47, %v1519_v56 }
 0x582   :  { %v1903_v57 = vpop.eup %1902  ;;  %v1502_v52 = vadd.f32 %v1899_v45, %v1501_v53 }
 0x583   :  { %v1521_v2 = vadd.f32 %v1901_v47, %v1520_v55  ;;  %v1538_v62 = vmul.f32 %v1903_v57, %v3493_v40  ;;  %v1905_v5 = vpop.eup %1904  ;;  %vm1543_vm14 = vweird.f32 %v1903_v57  ;;  %v1591_v40 = vperm.slane %v1589_v39, 0 }
 0x584   :  { %v1506_v32 = vsel %vm1505_vm10, %v1899_v45, %v1502_v52  ;;  %vm1544_vm0 = vmor %vm1542_vm15, %vm1543_vm14 }
 0x585   :  { %v1511_v6 = vsel %vm1508_vm12, %v1510_v58, %v1506_v32  ;;  %v1525_v10 = vsel %vm1524_vm11, %v1901_v47, %v1521_v2  ;;  %v1539_v15 = vsub.f32 1.0, %v1538_v62 }
 0x586   :  { %v1530_v8 = vsel %vm1527_vm13, %v1529_v63, %v1525_v10  ;;  %v1553_v22 = vmul.f32 %v1905_v5, %v1511_v6 }
 0x587   :  { %v1552_v14 = vmul.f32 %v1530_v8, %v3361_v36  ;;  %v1540_v24 = vmul.f32 %v1903_v57, %v1539_v15  ;;  %v1640_v36 = vld [vmem:[%s3598_s6 + $0x18] sm:$0xff] }
 0x588   :  { %1685 = vmatpush.msrb.mxu2 %v1640_v36 }
 0x589   :  { %v1554_v19 = vadd.f32 %v1553_v22, %v1552_v14  ;;  %v1541_v28 = vadd.f32 %v1903_v57, %v1540_v24 }
 0x58a   :  { %1686 = vmatpush.msrb.mxu2 %v1639_v43 }
 0x58b   :  { %1906 = vtanh.f32 %v1554_v19  ;;  %v1545_v20 = vsel %vm1544_vm0, %v1903_v57, %v1541_v28 }
 0x58c   :  { %v1550_v7 = vsel %vm1547_vm1, %v1549_v23, %v1545_v20  ;;  %1687 = vmatpush.msrb.mxu2 %v1638_v34 }
 0x58e   :  { %1688 = vmatpush.msrb.mxu2 %v1637_v37 }
 0x591   :  { %v1907_v25 = vpop.eup %1906 }
 0x592   :  { %v1556_v12 = vmul.f32 %v1907_v25, %v1550_v7 }
 0x594   :  { %1611 = vmatmul.f32.vlgmr.msrb.gmra.mxu0 %v1556_v12  ;;  %1631 = vmatmul.f32.vlgmr.msrb.gmra.mxu1 %v1556_v12 }
 0x611   :  { %v1612_v42 = vpop.f32.mrf.mxu0  ;;  %v1632_v45 = vpop.f32.mrf.mxu1 }
 0x612   :  { %v1613_v46 = vadd.f32 %v1612_v42, %v1591_v40  ;;  %v1633_v44 = vadd.f32 %v1632_v45, %v1592_v41 }
 0x614   :  { %v1635_v47 = vmax.f32 %v1613_v46, 0.0  ;;  %v1636_v51 = vmax.f32 %v1633_v44, 0.0 }
 0x616   :  { %1689 = vmatmul.f32.vlgmr.msrb.gmra.mxu2 %v1635_v47  ;;  %1709 = vmatmul.f32.vlgmr.msrb.gmra.mxu3 %v1636_v51 }
 0x699   :  { %v1690_v50 = vpop.f32.mrf.mxu2  ;;  %v1710_v16 = vpop.f32.mrf.mxu3 }
 0x69a   :  { %v1691_v0 = vadd.f32 %v1779_v59, %v1690_v50 }
 0x69c   :  { %v1711_v29 = vadd.f32 %v1710_v16, %v1691_v0 }
 0x69e   :  { %1713 = vst [vmem:[%s3601_s8] sm:$0xff] %v1711_v29 }

</bundles_post_ra>
